<compile_context>
chip_gen: v6e
topology: v6e:2x2x1
jax: 0.10.0
libtpu: 0.0.40
codegen_flags: <defaults>
</compile_context>

<pallas_src>
import functools

import jax
import jax.numpy as jnp
import numpy as np
from jax.experimental import pallas as pl
from jax.experimental.pallas import tpu as pltpu

CHEM_DIM = 300     # contextpred emb_dim
CHEM_PAD = 384     # pooled chem feature axis padded to a lane multiple
PROT_DIM = 256     # prot_embed_dim
H1 = 128           # interaction_pooler hidden
H2 = 64            # interaction_pooler out / binary_predictor hidden
OUT_PAD = 128      # lane-dense padded hidden/output width
VAL_RANGE = 2      # all_config['val_range']
BN_EPS = 1e-5


def _cdiv(a, b):
    return -(-a // b)


def _round_up(x, m):
    return ((x + m - 1) // m) * m


def _softmax_lastdim(x):
    m = jnp.max(x, axis=-1, keepdims=True)
    e = jnp.exp(x - m)
    return e * pl.reciprocal(jnp.sum(e, axis=-1, keepdims=True), approx=True)


def _make_dti_kernel(nt, tail):
    """tail = number of valid node rows in the last node tile (== nt when
    nmax divides evenly)."""

    def kernel(chem_ref, prot_ref, ap_ref, w1a_ref, w1b_ref,
               w2_ref, w3_ref, w4_ref, bias_ref, out_ref, acc_ref):
        f32, bf16 = jnp.float32, jnp.bfloat16
        k = pl.program_id(1)
        nk = pl.num_programs(1)

        @pl.when(k == 0)
        def _():
            acc_ref[...] = jnp.zeros_like(acc_ref)   # pad lanes stay 0

        # --- sum-pool the raw f32 chem node tile; pure f32 accumulate -------
        def _accum(x):
            acc_ref[:, :CHEM_DIM] += jnp.sum(x, axis=1, dtype=f32)

        if tail != nt:   # ragged node count: mask OOB rows of the last tile
            is_last = k == nk - 1

            @pl.when(is_last)
            def _():
                node = jax.lax.broadcasted_iota(jnp.int32, chem_ref.shape, 1)
                _accum(jnp.where(node < tail, chem_ref[...], 0.0))

            @pl.when(jnp.logical_not(is_last))
            def _():
                _accum(chem_ref[...])
        else:
            _accum(chem_ref[...])

        # --- epilogue: attentive pooling + folded-BN MLPs (runs once/tile) --
        @pl.when(k == nk - 1)
        def _():
            chem_pooled = acc_ref[...]               # (bt, 384) f32, pads = 0
            prot = prot_ref[...]                     # (bt, 256) f32
            ap = ap_ref[...]                         # (384, 256) bf16

            # AttentivePooling(300, 256):
            # wm1 = tanh(prot @ ap.T) via transposed contraction (one ap copy)
            wm1 = jnp.tanh(jax.lax.dot_general(
                prot.astype(bf16), ap, (((1,), (1,)), ((), ())),
                preferred_element_type=f32))                    # (bt, 384)
            wm2 = jnp.tanh(jnp.dot(chem_pooled.astype(bf16), ap,
                                   preferred_element_type=f32))  # (bt, 256)

            # mask the zero-padded chem-feature lanes out of the softmax
            lane = jax.lax.broadcasted_iota(jnp.int32, wm1.shape, 1)
            wm1 = jnp.where(lane < CHEM_DIM, wm1, -jnp.inf)

            chem_vec = chem_pooled * _softmax_lastdim(wm1)       # (bt, 384)
            prot_vec = prot * _softmax_lastdim(wm2)              # (bt, 256)

            b = bias_ref[...]
            b1, b2, b3, b4 = b[0:1], b[1:2], b[2:3], b[3:4]

            # interaction_pooler (BN folded): Lin(556,128)+ReLU, Lin(128,64)
            # torch.cat((chem, prot), 1) @ W1.T computed as a split matmul.
            h1 = (jnp.dot(chem_vec.astype(bf16), w1a_ref[...],
                          preferred_element_type=f32)
                  + jnp.dot(prot_vec.astype(bf16), w1b_ref[...],
                            preferred_element_type=f32) + b1)
            h1 = jnp.maximum(h1, 0.0)                            # (bt, 128)
            iv = jnp.dot(h1.astype(bf16), w2_ref[...],
                         preferred_element_type=f32) + b2        # (bt, 128)

            # binary_predictor (BN folded): Lin(64,64)+ReLU, Lin(64,V)
            h3 = jnp.maximum(jnp.dot(iv.astype(bf16), w3_ref[...],
                                     preferred_element_type=f32) + b3, 0.0)
            logits = jnp.dot(h3.astype(bf16), w4_ref[...],
                             preferred_element_type=f32) + b4    # (bt, 128)

            out_ref[...] = logits.astype(out_ref.dtype)

    return kernel


def _pad_to(x, shape):
    return jnp.pad(x, [(0, s - d) for d, s in zip(x.shape, shape)])


def _fold_bn(w, b, bn):
    # bn rows: 0=gamma, 1=beta, 2=running_mean, 3=running_var (eval mode)
    scale = bn[0] / jnp.sqrt(bn[3] + BN_EPS)
    return w * scale[:, None], (b - bn[2]) * scale + bn[1]


def _pick_batch_tile(B):
    """Minimize batch padding (kernel is DMA-bound on chem), prefer >=2 tiles
    so the 'parallel' batch axis can shard across v7x's two TensorCores,
    tie-break to the largest tile (fewer pipeline steps)."""
    best_bt, best_key = 8, None
    for bt in range(8, 72, 8):
        ntiles = _cdiv(B, bt)
        pad = ntiles * bt - B
        key = (0 if (ntiles >= 2 or B <= 8) else 1, pad, -bt)
        if best_key is None or key < best_key:
            best_bt, best_key = bt, key
    return best_bt


def _vmem_buf_bytes(shape, itemsize):
    """(sublane, lane)-padded footprint estimate of one VMEM buffer."""
    dims = list(shape)
    dims[-1] = _round_up(dims[-1], 128)
    if len(dims) >= 2:
        dims[-2] = _round_up(dims[-2], 8 if itemsize == 4 else 16)
    n = 1
    for d in dims:
        n *= d
    return n * itemsize


def _vmem_capacity_bytes():
    try:
        return int(pltpu.get_tpu_info().vmem_capacity_bytes)
    except Exception:
        return 64 << 20            # conservative fallback (v7x per-core VMEM)


@functools.partial(jax.jit, static_argnames=("node_tile",))
def dti_head(chem_nodes, prot, params, *, node_tile=None):
    """Pallas DTI head. chem_nodes (B, Nmax, 300) is fed raw (no wrapper
    pad/cast pass over the dominant stream); BN folding / weight transposes
    / small-weight padding stay in JAX."""
    B, nmax, cdim = chem_nodes.shape
    assert cdim == CHEM_DIM
    bf16, f32 = jnp.bfloat16, jnp.float32

    # --- generation-aware tiling -----------------------------------------
    bt = _pick_batch_tile(B)
    n_bt = _cdiv(B, bt)
    bp = n_bt * bt

    vmem_cap = _vmem_capacity_bytes()
    # chem double-buffer gets the lion's share of VMEM; capped so that v5e
    # (16 MiB default scoped / 128 MiB physical) and v7x (64 MiB physical)
    # are both comfortable once vmem_limit_bytes is set explicitly below.
    chem_budget = max(4 << 20, min(24 << 20, vmem_cap // 3))
    per_node_bytes = bt * _round_up(CHEM_DIM, 128) * 4
    nt_cap = max(8, ((chem_budget // (2 * per_node_bytes)) // 8) * 8)
    nt = min(_round_up(nmax, 8), nt_cap)
    if node_tile is not None:                       # testing / tuning hook
        nt = min(_round_up(node_tile, 8), _round_up(nmax, 8))
    nk = _cdiv(nmax, nt)
    tail = nmax - (nk - 1) * nt                     # valid rows in last tile

    # --- fold eval-mode BatchNorm into the preceding Linear; pad weights ---
    w1f, b1f = _fold_bn(params["w1"], params["b1"], params["bn1"])
    w2f, b2f = _fold_bn(params["w2"], params["b2"], params["bn2"])
    w3f, b3f = _fold_bn(params["w3"], params["b3"], params["bn3"])
    w4f, b4f = _fold_bn(params["w4"], params["b4"], params["bn4"])

    ap = _pad_to(params["ap_param"], (CHEM_PAD, PROT_DIM)).astype(bf16)
    w1a = _pad_to(w1f[:, :CHEM_DIM].T, (CHEM_PAD, H1)).astype(bf16)
    w1b = w1f[:, CHEM_DIM:].T.astype(bf16)                       # (256, 128)
    w2 = _pad_to(w2f.T, (H1, OUT_PAD)).astype(bf16)
    w3 = _pad_to(w3f.T, (OUT_PAD, OUT_PAD)).astype(bf16)
    w4 = _pad_to(w4f.T, (OUT_PAD, OUT_PAD)).astype(bf16)
    bias = jnp.stack([_pad_to(b1f, (OUT_PAD,)), _pad_to(b2f, (OUT_PAD,)),
                      _pad_to(b3f, (OUT_PAD,)), _pad_to(b4f, (OUT_PAD,))]
                     ).astype(f32)                               # (4, 128)

    # --- explicit VMEM budget for the double-buffered pipeline ------------
    weight_bufs = (_vmem_buf_bytes((CHEM_PAD, PROT_DIM), 2)
                   + _vmem_buf_bytes((CHEM_PAD, H1), 2)
                   + _vmem_buf_bytes((PROT_DIM, H1), 2)
                   + 3 * _vmem_buf_bytes((OUT_PAD, OUT_PAD), 2)
                   + _vmem_buf_bytes((4, OUT_PAD), 4))
    vmem_limit = (2 * (_vmem_buf_bytes((bt, nt, CHEM_DIM), 4)
                       + _vmem_buf_bytes((bt, PROT_DIM), 4)
                       + _vmem_buf_bytes((bt, OUT_PAD), 4)
                       + weight_bufs)
                  + _vmem_buf_bytes((bt, CHEM_PAD), 4)
                  + (6 << 20))                                   # headroom

    const = lambda i, k: (0, 0)
    out = pl.pallas_call(
        _make_dti_kernel(nt, tail),
        out_shape=jax.ShapeDtypeStruct((bp, OUT_PAD), jnp.float32),
        grid=(n_bt, nk),
        in_specs=[
            # raw chem stream: full-extent 300 last dim is legal; ragged
            # node / batch tails are handled in-kernel / discarded.
            pl.BlockSpec((bt, nt, CHEM_DIM), lambda i, k: (i, k, 0)),
            pl.BlockSpec((bt, PROT_DIM), lambda i, k: (i, 0)),
            pl.BlockSpec((CHEM_PAD, PROT_DIM), const),
            pl.BlockSpec((CHEM_PAD, H1), const),
            pl.BlockSpec((PROT_DIM, H1), const),
            pl.BlockSpec((H1, OUT_PAD), const),
            pl.BlockSpec((OUT_PAD, OUT_PAD), const),
            pl.BlockSpec((OUT_PAD, OUT_PAD), const),
            pl.BlockSpec((4, OUT_PAD), const),
        ],
        out_specs=pl.BlockSpec((bt, OUT_PAD), lambda i, k: (i, 0)),
        scratch_shapes=[pltpu.VMEM((bt, CHEM_PAD), jnp.float32)],
        compiler_params=pltpu.CompilerParams(
            dimension_semantics=("parallel", "arbitrary"),
            vmem_limit_bytes=int(vmem_limit)),
    )(chem_nodes, prot, ap, w1a, w1b, w2, w3, w4, bias)

    return out[:B, :VAL_RANGE]


def reference(chem_nodes, prot, params):
    """Pure-JAX reference mirroring the PyTorch forward (eval semantics)."""
    chem_pooled = jnp.sum(chem_nodes, axis=1)
    wm1 = jnp.tanh(prot @ params["ap_param"].T)
    wm2 = jnp.tanh(chem_pooled @ params["ap_param"])
    s1 = jax.nn.softmax(wm1, axis=-1)
    s2 = jax.nn.softmax(wm2, axis=-1)
    chem_vec = chem_pooled * s1
    prot_vec = prot * s2
    cat = jnp.concatenate([chem_vec, prot_vec], axis=1)

    def bn(x, p):
        return (x - p[2]) * (p[0] / jnp.sqrt(p[3] + BN_EPS)) + p[1]

    h1 = jnp.maximum(bn(cat @ params["w1"].T + params["b1"], params["bn1"]), 0.0)
    iv = bn(h1 @ params["w2"].T + params["b2"], params["bn2"])
    h3 = jnp.maximum(bn(iv @ params["w3"].T + params["b3"], params["bn3"]), 0.0)
    return bn(h3 @ params["w4"].T + params["b4"], params["bn4"])


def make_params(key):
    ks = jax.random.split(key, 16)

    def lin(k, out_f, in_f):
        bound = 1.0 / np.sqrt(in_f)
        kw, kb = jax.random.split(k)
        w = jax.random.uniform(kw, (out_f, in_f), jnp.float32, -bound, bound)
        b = jax.random.uniform(kb, (in_f,), jnp.float32, -bound, bound)[:out_f]
        return w, b

    def bn_params(k, dim):
        k1, k2, k3, k4 = jax.random.split(k, 4)
        gamma = jax.random.uniform(k1, (dim,), jnp.float32, 0.8, 1.2)
        beta = jax.random.uniform(k2, (dim,), jnp.float32, -0.1, 0.1)
        mean = jax.random.uniform(k3, (dim,), jnp.float32, -0.1, 0.1)
        var = jax.random.uniform(k4, (dim,), jnp.float32, 0.5, 1.5)
        return jnp.stack([gamma, beta, mean, var], axis=0)  # (4, dim)

    p = {}
    # AttentivePooling param (torch init is zeros; random for a non-degenerate test)
    p["ap_param"] = 0.05 * jax.random.normal(ks[0], (CHEM_DIM, PROT_DIM), jnp.float32)
    # interaction_pooler = EmbeddingTransform(556, 128, 64)
    p["w1"], p["b1"] = lin(ks[1], H1, CHEM_DIM + PROT_DIM)
    p["bn1"] = bn_params(ks[2], H1)
    p["w2"], p["b2"] = lin(ks[3], H2, H1)
    p["bn2"] = bn_params(ks[4], H2)
    # binary_predictor = EmbeddingTransform(64, 64, val_range)
    p["w3"], p["b3"] = lin(ks[5], H2, H2)
    p["bn3"] = bn_params(ks[6], H2)
    p["w4"], p["b4"] = lin(ks[7], VAL_RANGE, H2)
    p["bn4"] = bn_params(ks[8], VAL_RANGE)
    return p


if __name__ == "__main__":
    key = jax.random.PRNGKey(0)
    k_par, k_chem, k_prot, k_chem2, k_prot2 = jax.random.split(key, 5)

    params = make_params(k_par)

    # Case 1: small aligned shapes (single node tile, single batch tile).
    B, NMAX = 4, 16
    chem_nodes = jax.random.normal(k_chem, (B, NMAX, CHEM_DIM), jnp.float32)
    prot = jax.random.normal(k_prot, (B, PROT_DIM), jnp.float32)
    logits = jax.block_until_ready(dti_head(chem_nodes, prot, params))
    ref = reference(chem_nodes, prot, params)
    np.testing.assert_allclose(np.asarray(logits), np.asarray(ref),
                               rtol=2e-2, atol=2e-2)
    assert logits.shape == (B, VAL_RANGE)

    # Case 2: ragged shapes exercising the multi-step node reduction, the
    # masked tail node tile and a partial batch tile.
    B2, NMAX2 = 5, 20
    chem2 = jax.random.normal(k_chem2, (B2, NMAX2, CHEM_DIM), jnp.float32)
    prot2 = jax.random.normal(k_prot2, (B2, PROT_DIM), jnp.float32)
    logits2 = jax.block_until_ready(dti_head(chem2, prot2, params, node_tile=8))
    ref2 = reference(chem2, prot2, params)
    np.testing.assert_allclose(np.asarray(logits2), np.asarray(ref2),
                               rtol=2e-2, atol=2e-2)
    assert logits2.shape == (B2, VAL_RANGE)

    print("KERNEL_OK")
</pallas_src>

<mosaic_0001>
module attributes {stable_mosaic.version = 11 : i64} {
  func.func @kernel(%arg0: i32, %arg1: i32, %arg2: memref<8x16x300xf32, #tpu.memory_space<vmem>>, %arg3: memref<8x256xf32, #tpu.memory_space<vmem>>, %arg4: memref<384x256xbf16, #tpu.memory_space<vmem>>, %arg5: memref<384x128xbf16, #tpu.memory_space<vmem>>, %arg6: memref<256x128xbf16, #tpu.memory_space<vmem>>, %arg7: memref<128x128xbf16, #tpu.memory_space<vmem>>, %arg8: memref<128x128xbf16, #tpu.memory_space<vmem>>, %arg9: memref<128x128xbf16, #tpu.memory_space<vmem>>, %arg10: memref<4x128xf32, #tpu.memory_space<vmem>>, %arg11: memref<8x128xf32, #tpu.memory_space<vmem>>, %arg12: memref<8x384xf32, #tpu.memory_space<vmem>>) attributes {dimension_semantics = [#tpu.dimension_semantics<parallel>, #tpu.dimension_semantics<arbitrary>], iteration_bounds = array<i64: 1, 1>, scalar_prefetch = 0 : i64, scratch_operands = 1 : i64, tpu.core_type = #tpu.core_type<tc>, window_params = [{transform_indices = @transform_0, window_bounds = array<i64: 8, 16, 300>}, {transform_indices = @transform_1, window_bounds = array<i64: 8, 256>}, {pipeline_mode = #tpu.pipeline_mode<synchronous>, transform_indices = @transform_2, window_bounds = array<i64: 384, 256>}, {pipeline_mode = #tpu.pipeline_mode<synchronous>, transform_indices = @transform_3, window_bounds = array<i64: 384, 128>}, {pipeline_mode = #tpu.pipeline_mode<synchronous>, transform_indices = @transform_4, window_bounds = array<i64: 256, 128>}, {pipeline_mode = #tpu.pipeline_mode<synchronous>, transform_indices = @transform_5, window_bounds = array<i64: 128, 128>}, {pipeline_mode = #tpu.pipeline_mode<synchronous>, transform_indices = @transform_6, window_bounds = array<i64: 128, 128>}, {pipeline_mode = #tpu.pipeline_mode<synchronous>, transform_indices = @transform_7, window_bounds = array<i64: 128, 128>}, {pipeline_mode = #tpu.pipeline_mode<synchronous>, transform_indices = @transform_8, window_bounds = array<i64: 4, 128>}, {transform_indices = @transform_9, window_bounds = array<i64: 8, 128>}]} {
    %c0_i32 = arith.constant 0 : i32
    %0 = arith.cmpi eq, %arg1, %c0_i32 : i32
    %1 = arith.extui %0 : i1 to i32
    %c0_i32_0 = arith.constant 0 : i32
    %2 = arith.cmpi ne, %1, %c0_i32_0 : i32
    scf.if %2 {
      %cst_9 = arith.constant 0.000000e+00 : f32
      %11 = vector.broadcast %cst_9 : f32 to vector<8x384xf32>
      %c0_10 = arith.constant 0 : index
      %c0_11 = arith.constant 0 : index
      %12 = vector.load %arg12[%c0_10, %c0_11] : memref<8x384xf32, #tpu.memory_space<vmem>>, vector<8x384xf32>
      tpu.vector_store %arg12[%c0_10, %c0_11], %11 {strides = array<i32>} : memref<8x384xf32, #tpu.memory_space<vmem>>, vector<8x384xf32>,
    } else {
    }
    %c0 = arith.constant 0 : index
    %c0_1 = arith.constant 0 : index
    %c0_2 = arith.constant 0 : index
    %3 = vector.load %arg2[%c0, %c0_1, %c0_2] : memref<8x16x300xf32, #tpu.memory_space<vmem>>, vector<8x16x300xf32>
    %c0_3 = arith.constant 0 : index
    %c0_4 = arith.constant 0 : index
    %4 = vector.load %arg12[%c0_3, %c0_4] : memref<8x384xf32, #tpu.memory_space<vmem>>, vector<8x300xf32>
    %cst = arith.constant dense<0.000000e+00> : vector<8x300xf32>
    %5 = vector.multi_reduction <add>, %3, %cst [1] : vector<8x16x300xf32> to vector<8x300xf32>
    %6 = arith.addf %4, %5 : vector<8x300xf32>
    %c0_5 = arith.constant 0 : index
    %c0_6 = arith.constant 0 : index
    %7 = vector.load %arg12[%c0_5, %c0_6] : memref<8x384xf32, #tpu.memory_space<vmem>>, vector<8x300xf32>
    tpu.vector_store %arg12[%c0_5, %c0_6], %6 {strides = array<i32>} : memref<8x384xf32, #tpu.memory_space<vmem>>, vector<8x300xf32>,
    %c0_i32_7 = arith.constant 0 : i32
    %8 = arith.cmpi eq, %arg1, %c0_i32_7 : i32
    %9 = arith.extui %8 : i1 to i32
    %c0_i32_8 = arith.constant 0 : i32
    %10 = arith.cmpi ne, %9, %c0_i32_8 : i32
    scf.if %10 {
      %c0_9 = arith.constant 0 : index
      %c0_10 = arith.constant 0 : index
      %11 = vector.load %arg12[%c0_9, %c0_10] : memref<8x384xf32, #tpu.memory_space<vmem>>, vector<8x384xf32>
      %c0_11 = arith.constant 0 : index
      %c0_12 = arith.constant 0 : index
      %12 = vector.load %arg3[%c0_11, %c0_12] : memref<8x256xf32, #tpu.memory_space<vmem>>, vector<8x256xf32>
      %c0_13 = arith.constant 0 : index
      %c0_14 = arith.constant 0 : index
      %13 = vector.load %arg4[%c0_13, %c0_14] : memref<384x256xbf16, #tpu.memory_space<vmem>>, vector<384x256xbf16>
      %14 = arith.truncf %12 : vector<8x256xf32> to vector<8x256xbf16>
      %cst_15 = arith.constant dense<0.000000e+00> : vector<8x384xf32>
      %15 = tpu.matmul %14, %13, %cst_15 {dimension_numbers = #tpu.dot_dimension_numbers<[1], [1], [0], [0], [0, 0, 1, 0], [], []>} : vector<8x256xbf16>, vector<384x256xbf16>, vector<8x384xf32> -> vector<8x384xf32>
      %16 = math.tanh %15 : vector<8x384xf32>
      %17 = arith.truncf %11 : vector<8x384xf32> to vector<8x384xbf16>
      %cst_16 = arith.constant dense<0.000000e+00> : vector<8x256xf32>
      %18 = tpu.matmul %17, %13, %cst_16 {dimension_numbers = #tpu.dot_dimension_numbers<[1], [0], [0], [1], [0, 0, 1, 1], [], []>} : vector<8x384xbf16>, vector<384x256xbf16>, vector<8x256xf32> -> vector<8x256xf32>
      %19 = math.tanh %18 : vector<8x256xf32>
      %20 = tpu.iota {dimensions = array<i32: 1>} : vector<8x384xi32>
      %c300_i32 = arith.constant 300 : i32
      %21 = vector.broadcast %c300_i32 : i32 to vector<8x384xi32>
      %22 = arith.cmpi slt, %20, %21 : vector<8x384xi32>
      %cst_17 = arith.constant 0xFF800000 : f32
      %23 = vector.broadcast %cst_17 : f32 to vector<8x384xf32>
      %24 = arith.select %22, %16, %23 : vector<8x384xi1>, vector<8x384xf32>
      %cst_18 = arith.constant dense<0xFF800000> : vector<8xf32>
      %25 = vector.multi_reduction <maximumf>, %24, %cst_18 [1] : vector<8x384xf32> to vector<8xf32>
      %26 = vector.shape_cast %25 : vector<8xf32> to vector<8x1xf32>
      %27 = vector.broadcast %26 : vector<8x1xf32> to vector<8x384xf32>
      %28 = arith.subf %24, %27 : vector<8x384xf32>
      %29 = math.exp %28 : vector<8x384xf32>
      %cst_19 = arith.constant dense<0.000000e+00> : vector<8xf32>
      %30 = vector.multi_reduction <add>, %29, %cst_19 [1] : vector<8x384xf32> to vector<8xf32>
      %31 = vector.shape_cast %30 : vector<8xf32> to vector<8x1xf32>
      %32 = tpu.reciprocal %31 {approx = true} : vector<8x1xf32> -> vector<8x1xf32>
      %33 = vector.broadcast %32 : vector<8x1xf32> to vector<8x384xf32>
      %34 = arith.mulf %29, %33 : vector<8x384xf32>
      %35 = arith.mulf %11, %34 : vector<8x384xf32>
      %cst_20 = arith.constant dense<0xFF800000> : vector<8xf32>
      %36 = vector.multi_reduction <maximumf>, %19, %cst_20 [1] : vector<8x256xf32> to vector<8xf32>
      %37 = vector.shape_cast %36 : vector<8xf32> to vector<8x1xf32>
      %38 = vector.broadcast %37 : vector<8x1xf32> to vector<8x256xf32>
      %39 = arith.subf %19, %38 : vector<8x256xf32>
      %40 = math.exp %39 : vector<8x256xf32>
      %cst_21 = arith.constant dense<0.000000e+00> : vector<8xf32>
      %41 = vector.multi_reduction <add>, %40, %cst_21 [1] : vector<8x256xf32> to vector<8xf32>
      %42 = vector.shape_cast %41 : vector<8xf32> to vector<8x1xf32>
      %43 = tpu.reciprocal %42 {approx = true} : vector<8x1xf32> -> vector<8x1xf32>
      %44 = vector.broadcast %43 : vector<8x1xf32> to vector<8x256xf32>
      %45 = arith.mulf %40, %44 : vector<8x256xf32>
      %46 = arith.mulf %12, %45 : vector<8x256xf32>
      %c0_22 = arith.constant 0 : index
      %c0_23 = arith.constant 0 : index
      %47 = vector.load %arg10[%c0_22, %c0_23] : memref<4x128xf32, #tpu.memory_space<vmem>>, vector<4x128xf32>
      %48 = vector.extract_strided_slice %47 {offsets = [0, 0], sizes = [1, 128], strides = [1, 1]} : vector<4x128xf32> to vector<1x128xf32>
      %49 = vector.extract_strided_slice %47 {offsets = [1, 0], sizes = [1, 128], strides = [1, 1]} : vector<4x128xf32> to vector<1x128xf32>
      %50 = vector.extract_strided_slice %47 {offsets = [2, 0], sizes = [1, 128], strides = [1, 1]} : vector<4x128xf32> to vector<1x128xf32>
      %51 = vector.extract_strided_slice %47 {offsets = [3, 0], sizes = [1, 128], strides = [1, 1]} : vector<4x128xf32> to vector<1x128xf32>
      %52 = arith.truncf %35 : vector<8x384xf32> to vector<8x384xbf16>
      %c0_24 = arith.constant 0 : index
      %c0_25 = arith.constant 0 : index
      %53 = vector.load %arg5[%c0_24, %c0_25] : memref<384x128xbf16, #tpu.memory_space<vmem>>, vector<384x128xbf16>
      %cst_26 = arith.constant dense<0.000000e+00> : vector<8x128xf32>
      %54 = tpu.matmul %52, %53, %cst_26 {dimension_numbers = #tpu.dot_dimension_numbers<[1], [0], [0], [1], [0, 0, 1, 1], [], []>} : vector<8x384xbf16>, vector<384x128xbf16>, vector<8x128xf32> -> vector<8x128xf32>
      %55 = arith.truncf %46 : vector<8x256xf32> to vector<8x256xbf16>
      %c0_27 = arith.constant 0 : index
      %c0_28 = arith.constant 0 : index
      %56 = vector.load %arg6[%c0_27, %c0_28] : memref<256x128xbf16, #tpu.memory_space<vmem>>, vector<256x128xbf16>
      %cst_29 = arith.constant dense<0.000000e+00> : vector<8x128xf32>
      %57 = tpu.matmul %55, %56, %cst_29 {dimension_numbers = #tpu.dot_dimension_numbers<[1], [0], [0], [1], [0, 0, 1, 1], [], []>} : vector<8x256xbf16>, vector<256x128xbf16>, vector<8x128xf32> -> vector<8x128xf32>
      %58 = arith.addf %54, %57 : vector<8x128xf32>
      %59 = vector.broadcast %48 : vector<1x128xf32> to vector<8x128xf32>
      %60 = arith.addf %58, %59 : vector<8x128xf32>
      %cst_30 = arith.constant 0.000000e+00 : f32
      %61 = vector.broadcast %cst_30 : f32 to vector<8x128xf32>
      %62 = arith.maximumf %60, %61 : vector<8x128xf32>
      %63 = arith.truncf %62 : vector<8x128xf32> to vector<8x128xbf16>
      %c0_31 = arith.constant 0 : index
      %c0_32 = arith.constant 0 : index
      %64 = vector.load %arg7[%c0_31, %c0_32] : memref<128x128xbf16, #tpu.memory_space<vmem>>, vector<128x128xbf16>
      %cst_33 = arith.constant dense<0.000000e+00> : vector<8x128xf32>
      %65 = tpu.matmul %63, %64, %cst_33 {dimension_numbers = #tpu.dot_dimension_numbers<[1], [0], [0], [1], [0, 0, 1, 1], [], []>} : vector<8x128xbf16>, vector<128x128xbf16>, vector<8x128xf32> -> vector<8x128xf32>
      %66 = vector.broadcast %49 : vector<1x128xf32> to vector<8x128xf32>
      %67 = arith.addf %65, %66 : vector<8x128xf32>
      %68 = arith.truncf %67 : vector<8x128xf32> to vector<8x128xbf16>
      %c0_34 = arith.constant 0 : index
      %c0_35 = arith.constant 0 : index
      %69 = vector.load %arg8[%c0_34, %c0_35] : memref<128x128xbf16, #tpu.memory_space<vmem>>, vector<128x128xbf16>
      %cst_36 = arith.constant dense<0.000000e+00> : vector<8x128xf32>
      %70 = tpu.matmul %68, %69, %cst_36 {dimension_numbers = #tpu.dot_dimension_numbers<[1], [0], [0], [1], [0, 0, 1, 1], [], []>} : vector<8x128xbf16>, vector<128x128xbf16>, vector<8x128xf32> -> vector<8x128xf32>
      %71 = vector.broadcast %50 : vector<1x128xf32> to vector<8x128xf32>
      %72 = arith.addf %70, %71 : vector<8x128xf32>
      %cst_37 = arith.constant 0.000000e+00 : f32
      %73 = vector.broadcast %cst_37 : f32 to vector<8x128xf32>
      %74 = arith.maximumf %72, %73 : vector<8x128xf32>
      %75 = arith.truncf %74 : vector<8x128xf32> to vector<8x128xbf16>
      %c0_38 = arith.constant 0 : index
      %c0_39 = arith.constant 0 : index
      %76 = vector.load %arg9[%c0_38, %c0_39] : memref<128x128xbf16, #tpu.memory_space<vmem>>, vector<128x128xbf16>
      %cst_40 = arith.constant dense<0.000000e+00> : vector<8x128xf32>
      %77 = tpu.matmul %75, %76, %cst_40 {dimension_numbers = #tpu.dot_dimension_numbers<[1], [0], [0], [1], [0, 0, 1, 1], [], []>} : vector<8x128xbf16>, vector<128x128xbf16>, vector<8x128xf32> -> vector<8x128xf32>
      %78 = vector.broadcast %51 : vector<1x128xf32> to vector<8x128xf32>
      %79 = arith.addf %77, %78 : vector<8x128xf32>
      %c0_41 = arith.constant 0 : index
      %c0_42 = arith.constant 0 : index
      %80 = vector.load %arg11[%c0_41, %c0_42] : memref<8x128xf32, #tpu.memory_space<vmem>>, vector<8x128xf32>
      tpu.vector_store %arg11[%c0_41, %c0_42], %79 {strides = array<i32>} : memref<8x128xf32, #tpu.memory_space<vmem>>, vector<8x128xf32>,
    } else {
    }
    return
  }
  func.func @transform_0(%arg0: i32, %arg1: i32) -> (i32, i32, i32) {
    %c0_i32 = arith.constant 0 : i32
    %c0_i32_0 = arith.constant 0 : i32
    return %arg0, %arg1, %c0_i32 : i32, i32, i32
  }
  func.func @transform_1(%arg0: i32, %arg1: i32) -> (i32, i32) {
    %c0_i32 = arith.constant 0 : i32
    %c0_i32_0 = arith.constant 0 : i32
    return %arg0, %c0_i32 : i32, i32
  }
  func.func @transform_2(%arg0: i32, %arg1: i32) -> (i32, i32) {
    %c0_i32 = arith.constant 0 : i32
    %c0_i32_0 = arith.constant 0 : i32
    %c0_i32_1 = arith.constant 0 : i32
    return %c0_i32, %c0_i32_0 : i32, i32
  }
  func.func @transform_3(%arg0: i32, %arg1: i32) -> (i32, i32) {
    %c0_i32 = arith.constant 0 : i32
    %c0_i32_0 = arith.constant 0 : i32
    %c0_i32_1 = arith.constant 0 : i32
    return %c0_i32, %c0_i32_0 : i32, i32
  }
  func.func @transform_4(%arg0: i32, %arg1: i32) -> (i32, i32) {
    %c0_i32 = arith.constant 0 : i32
    %c0_i32_0 = arith.constant 0 : i32
    %c0_i32_1 = arith.constant 0 : i32
    return %c0_i32, %c0_i32_0 : i32, i32
  }
  func.func @transform_5(%arg0: i32, %arg1: i32) -> (i32, i32) {
    %c0_i32 = arith.constant 0 : i32
    %c0_i32_0 = arith.constant 0 : i32
    %c0_i32_1 = arith.constant 0 : i32
    return %c0_i32, %c0_i32_0 : i32, i32
  }
  func.func @transform_6(%arg0: i32, %arg1: i32) -> (i32, i32) {
    %c0_i32 = arith.constant 0 : i32
    %c0_i32_0 = arith.constant 0 : i32
    %c0_i32_1 = arith.constant 0 : i32
    return %c0_i32, %c0_i32_0 : i32, i32
  }
  func.func @transform_7(%arg0: i32, %arg1: i32) -> (i32, i32) {
    %c0_i32 = arith.constant 0 : i32
    %c0_i32_0 = arith.constant 0 : i32
    %c0_i32_1 = arith.constant 0 : i32
    return %c0_i32, %c0_i32_0 : i32, i32
  }
  func.func @transform_8(%arg0: i32, %arg1: i32) -> (i32, i32) {
    %c0_i32 = arith.constant 0 : i32
    %c0_i32_0 = arith.constant 0 : i32
    %c0_i32_1 = arith.constant 0 : i32
    return %c0_i32, %c0_i32_0 : i32, i32
  }
  func.func @transform_9(%arg0: i32, %arg1: i32) -> (i32, i32) {
    %c0_i32 = arith.constant 0 : i32
    %c0_i32_0 = arith.constant 0 : i32
    return %arg0, %c0_i32 : i32, i32
  }
}

</mosaic_0001>

<bundles_post_ra>
// kernel: dti_head.1
= control target key start
LH: loop header
LB: loop body
LE: loop exit
PB: predicated region body
PF: predicated region fallthrough
CT: control target
= control target key end

     0   :  { %v2962_v14 = vmov 0.0   ;;  %vm105_vm0 = vcmask 359424   ;;  %vm300_vm1 = vcmask 1041409   ;;  %vm302_vm2 = vcmask 1042434   ;;  %s2952_s2 = inlined_call_operand.vmem [shape: bf16[384,256], index: 2, kind: input, shape index: {}]   ;;  %s2953_s1 = inlined_call_operand.vmem [shape: f32[4,256], index: 1, kind: input, shape index: {}]   ;;  %s2954_s0 = inlined_call_operand.vmem [shape: f32[4,16,300], index: 0, kind: input, shape index: {}]   ;;  %s2955_s4 = inlined_call_operand.vmem [shape: bf16[256,128], index: 4, kind: input, shape index: {}]   ;;  %s2956_s3 = inlined_call_operand.vmem [shape: bf16[384,128], index: 3, kind: input, shape index: {}]   ;;  %s2957_s5 = inlined_call_operand.vmem [shape: bf16[128,128], index: 5, kind: input, shape index: {}]   ;;  %s2958_s6 = inlined_call_operand.vmem [shape: bf16[128,128], index: 6, kind: input, shape index: {}]   ;;  %s2959_s8 = inlined_call_operand.vmem [shape: f32[4,128], index: 8, kind: input, shape index: {}]   ;;  %s2960_s7 = inlined_call_operand.vmem [shape: bf16[128,128], index: 7, kind: input, shape index: {}]   ;;  %s2961_s9 = inlined_call_operand.vmem [shape: f32[8,128], index: 9, kind: output, shape index: {}]  }
   0x1   :  { %v2155_v0 = vld [vmem:[%s2952_s2 + $0x74] ss:$8 sps:$4 sm:$0xff]   ;;  %v2160_v1 = vld [vmem:[%s2952_s2 + $0x70] ss:$8 sps:$4 sm:$0xff]   ;;  %v2166_v2 = vld [vmem:[%s2952_s2 + $0x64] ss:$8 sps:$4 sm:$0xff]  }
   0x2   :  { %641 = vmatprep.subr.bf16.mxu0 %v2155_v0  ;;  %v2173_v3 = vld [vmem:[%s2952_s2 + $0x174] ss:$8 sps:$4 sm:$0xff]   ;;  %v2178_v4 = vld [vmem:[%s2952_s2 + $0x170] ss:$8 sps:$4 sm:$0xff]   ;;  %v2183_v5 = vld [vmem:[%s2952_s2 + $0x60] ss:$8 sps:$4 sm:$0xff]  }
   0x3   :  { %642 = vmatpush1.bf16.xpose.msra.mxu0 %v2160_v1  ;;  %v2188_v6 = vld [vmem:[%s2952_s2 + $0x54] ss:$8 sps:$4 sm:$0xff]   ;;  %682 = vmatprep.subr.bf16.mxu1 %v2173_v3  ;;  %v2194_v7 = vld [vmem:[%s2952_s2 + $0x164] ss:$8 sps:$4 sm:$0xff]   ;;  %v2203_v8 = vld [vmem:[%s2952_s2 + $0x160] ss:$8 sps:$4 sm:$0xff]  }
   0x4   :  { %643 = vmatprep.subr.bf16.mxu0 %v2166_v2  ;;  %683 = vmatpush1.bf16.xpose.msra.mxu1 %v2178_v4  ;;  %v2208_v9 = vld [vmem:[%s2952_s2 + $0x154] ss:$8 sps:$4 sm:$0xff]   ;;  %v2213_v10 = vld [vmem:[%s2952_s2 + $0x50] ss:$8 sps:$4 sm:$0xff]   ;;  %v2218_v11 = vld [vmem:[%s2952_s2 + $0x44] ss:$8 sps:$4 sm:$0xff]  }
   0x5   :  { %684 = vmatprep.subr.bf16.mxu1 %v2194_v7  ;;  %v2227_v12 = vld [vmem:[%s2952_s2 + $0x150] ss:$8 sps:$4 sm:$0xff]   ;;  %v2232_v13 = vld [vmem:[%s2952_s2 + $0x144] ss:$8 sps:$4 sm:$0xff]   ;;  %39 = vst [vmem:[#allocation2 + $0x10] sm:$0xff] %v2962_v14  ;;  %vm304_vm3 = vcmask 1043459  }
   0x6   :  { %v2238_v15 = vld [vmem:[%s2952_s2 + $0x40] ss:$8 sps:$4 sm:$0xff]   ;;  %v2243_v16 = vld [vmem:[%s2952_s2 + $0x34] ss:$8 sps:$4 sm:$0xff]   ;;  %v2268_v23 = vld [vmem:[%s2952_s2 + $0x30] ss:$8 sps:$4 sm:$0xff]  }
   0x7   :  { %v343_v17 = vld [vmem:[%s2953_s1] sm:$0xff]  ;;  %v344_v18 = vld [vmem:[%s2953_s1 + $0x8] sm:$0xff]  ;;  %v2263_v21 = vld [vmem:[%s2952_s2 + $0x134] ss:$8 sps:$4 sm:$0xff]   ;;  %vm306_vm4 = vcmask 1044484   ;;  %vm308_vm5 = vcmask 1045509  }
   0x8   :  { %v396_v19 = vcombine.high %v343_v17, %v344_v18  ;;  %v2258_v20 = vld [vmem:[%s2952_s2 + $0x140] ss:$8 sps:$4 sm:$0xff]   ;;  %v2273_v24 = vld [vmem:[%s2952_s2 + $0x24] ss:$8 sps:$4 sm:$0xff]   ;;  %v395_v25 = vcombine.low %v343_v17, %v344_v18  ;;  %v42_v27 = vld [vmem:[%s2954_s0 + $0x10] sm:$0xff]  ;;  %vm310_vm6 = vcmask 1046534  }
   0x9   :  { %v41_v26 = vld [vmem:[%s2954_s0 + $0x8] sm:$0xff]  ;;  %v44_v28 = vld [vmem:[%s2954_s0 + $0x20] sm:$0xff]  ;;  %v47_v30 = vld [vmem:[%s2954_s0 + $0x38] sm:$0xff]  ;;  %v106_v34 = vsel %vm105_vm0, %v42_v27, 0.0  ;;  %vm312_vm7 = vcmask 1047559   ;;  %vm2101_vm9 = vmmov 0  }
   0xa   :  { %v400_v22 = vpack.c.bf16 %v396_v19, %v396_v19  ;;  %v45_v29 = vld [vmem:[%s2954_s0 + $0x28] sm:$0xff]  ;;  %v48_v31 = vld [vmem:[%s2954_s0 + $0x40] sm:$0xff]  ;;  %v50_v32 = vld [vmem:[%s2954_s0 + $0x50] sm:$0xff]  ;;  %v98_v33 = vadd.f32 %v44_v28, %v41_v26  ;;  %v2317_v43 = vpack.c.bf16 %v395_v25, %v395_v25 }
   0xb   :  { %644 = vmatpush1.bf16.xpose.msra.mxu0 %v2183_v5  ;;  %v107_v35 = vsel %vm105_vm0, %v45_v29, 0.0  ;;  %v2304_v36 = vld [vmem:[%s2952_s2 + $0x130] ss:$8 sps:$4 sm:$0xff]   ;;  %v53_v38 = vld [vmem:[%s2954_s0 + $0x68] sm:$0xff]  ;;  %v122_v41 = vadd.f32 %v50_v32, %v47_v30  ;;  %v129_v42 = vsel %vm105_vm0, %v48_v31, 0.0  ;;  %v56_v44 = vld [vmem:[%s2954_s0 + $0x80] sm:$0xff] }
   0xc   :  { %645 = vmatprep.subr.bf16.mxu0 %v2188_v6  ;;  %685 = vmatpush1.bf16.xpose.msra.mxu1 %v2203_v8  ;;  %v51_v37 = vld [vmem:[%s2954_s0 + $0x58] sm:$0xff]  ;;  %v54_v39 = vld [vmem:[%s2954_s0 + $0x70] sm:$0xff]  ;;  %v108_v40 = vadd.f32 %v107_v35, %v106_v34  ;;  %v57_v45 = vld [vmem:[%s2954_s0 + $0x88] sm:$0xff]  ;;  %v99_v47 = vrot.slane %v98_v33, 4  ;;  %v145_v56 = vadd.f32 %v56_v44, %v53_v38 }
   0xd   :  { %686 = vmatprep.subr.bf16.mxu1 %v2208_v9  ;;  %714 = vmatprep.mubr.bf16.mxu1 %v400_v22  ;;  %v59_v46 = vld [vmem:[%s2954_s0 + $0x98] sm:$0xff]  ;;  %v130_v48 = vsel %vm105_vm0, %v51_v37, 0.0  ;;  %v152_v49 = vsel %vm105_vm0, %v54_v39, 0.0  ;;  %v60_v50 = vld [vmem:[%s2954_s0 + $0xa0] sm:$0xff]  ;;  %v62_v51 = vld [vmem:[%s2954_s0 + $0xb0] sm:$0xff]  ;;  %v123_v54 = vrot.slane %v122_v41, 4 }
   0xe   :  { %673 = vmatprep.mubr.bf16.mxu0 %v400_v22  ;;  %v63_v52 = vld [vmem:[%s2954_s0 + $0xb8] sm:$0xff]  ;;  %v109_v53 = vrot.slane %v108_v40, 4  ;;  %v131_v55 = vadd.f32 %v130_v48, %v129_v42  ;;  %v2342_v57 = vld [vmem:[%s2952_s2 + $0x124] ss:$8 sps:$4 sm:$0xff]   ;;  %v100_v58 = vadd.f32 %v99_v47, %v98_v33  ;;  %v153_v59 = vsel %vm105_vm0, %v57_v45, 0.0 }
   0xf   :  { %2969 = vst [vmem:[#allocation3_spill] sm:$0xff] %v2342_v57  ;;  %v168_v60 = vadd.f32 %v62_v51, %v59_v46  ;;  %v175_v61 = vsel %vm105_vm0, %v60_v50, 0.0  ;;  %v2349_v62 = vld [vmem:[%s2952_s2 + $0x20] ss:$8 sps:$4 sm:$0xff]   ;;  %v124_v17 = vadd.f32 %v123_v54, %v122_v41  ;;  %v146_v19 = vrot.slane %v145_v56, 4 }
  0x10   :  { %v110_v63 = vadd.f32 %v109_v53, %v108_v40  ;;  %v132_v18 = vrot.slane %v131_v55, 4  ;;  %v2354_v22 = vld [vmem:[%s2952_s2 + $0x14] ss:$8 sps:$4 sm:$0xff]   ;;  %v101_v25 = vrot.slane %v100_v58, 2  ;;  %v154_v26 = vadd.f32 %v153_v59, %v152_v49  ;;  %v2364_v47 = vld [vmem:[%s2952_s2 + $0x10] ss:$8 sps:$4 sm:$0xff]  }
  0x11   :  { %v169_v27 = vrot.slane %v168_v60, 4  ;;  %v176_v28 = vsel %vm105_vm0, %v63_v52, 0.0  ;;  %v125_v30 = vrot.slane %v124_v17, 2  ;;  %v147_v32 = vadd.f32 %v146_v19, %v145_v56  ;;  %v2369_v48 = vld [vmem:[%s2952_s2 + $0x120] ss:$8 sps:$4 sm:$0xff]   ;;  %v66_v56 = vld [vmem:[%s2954_s0 + $0xd0] sm:$0xff] }
  0x12   :  { %v111_v29 = vrot.slane %v110_v63, 2  ;;  %v133_v31 = vadd.f32 %v132_v18, %v131_v55  ;;  %v102_v33 = vadd.f32 %v101_v25, %v100_v58  ;;  %v155_v34 = vrot.slane %v154_v26, 4  ;;  %2970 = vst [vmem:[#allocation4_spill] sm:$0xff] %v2369_v48  ;;  %v65_v49 = vld [vmem:[%s2954_s0 + $0xc8] sm:$0xff]  ;;  %v68_v50 = vld [vmem:[%s2954_s0 + $0xe0] sm:$0xff]  ;;  %v71_v18 = vld [vmem:[%s2954_s0 + $0xf8] sm:$0xff] }
  0x13   :  { %646 = vmatpush1.bf16.xpose.msra.mxu0 %v2213_v10  ;;  %v170_v35 = vadd.f32 %v169_v27, %v168_v60  ;;  %v177_v37 = vadd.f32 %v176_v28, %v175_v61  ;;  %v126_v39 = vadd.f32 %v125_v30, %v124_v17  ;;  %v148_v41 = vrot.slane %v147_v32, 2  ;;  %v2380_v55 = vld [vmem:[%s2952_s2 + $0x114] ss:$8 sps:$4 sm:$0xff]   ;;  %v69_v58 = vld [vmem:[%s2954_s0 + $0xe8] sm:$0xff]  ;;  %v72_v28 = vld [vmem:[%s2954_s0 + $0x100] sm:$0xff] }
  0x14   :  { %647 = vmatprep.subr.bf16.mxu0 %v2218_v11  ;;  %687 = vmatpush1.bf16.xpose.msra.mxu1 %v2227_v12  ;;  %v112_v38 = vadd.f32 %v111_v29, %v110_v63  ;;  %v134_v40 = vrot.slane %v133_v31, 2  ;;  %v103_v42 = vrot.slane %v102_v33, 1  ;;  %v156_v44 = vadd.f32 %v155_v34, %v154_v26  ;;  %2971 = vst [vmem:[#allocation5_spill] sm:$0xff] %v2380_v55  ;;  %v2393_v17 = vld [vmem:[%s2952_s2 + $0x4] ss:$8 sps:$4 sm:$0xff]   ;;  %v74_v29 = vld [vmem:[%s2954_s0 + $0x110] sm:$0xff] }
  0x15   :  { %688 = vmatprep.subr.bf16.mxu1 %v2232_v13  ;;  %v171_v45 = vrot.slane %v170_v35, 2  ;;  %v178_v46 = vrot.slane %v177_v37, 4  ;;  %v127_v52 = vrot.slane %v126_v39, 1  ;;  %v149_v54 = vadd.f32 %v148_v41, %v147_v32  ;;  %v75_v30 = vld [vmem:[%s2954_s0 + $0x118] sm:$0xff]  ;;  %v78_v41 = vld [vmem:[%s2954_s0 + $0x130] sm:$0xff] }
  0x16   :  { %v113_v51 = vrot.slane %v112_v38, 1  ;;  %v135_v53 = vadd.f32 %v134_v40, %v133_v31  ;;  %v2388_v59 = vadd.f32 %v103_v42, %v102_v33  ;;  %v157_v60 = vrot.slane %v156_v44, 2  ;;  %v77_v40 = vld [vmem:[%s2954_s0 + $0x128] sm:$0xff]  ;;  %v80_v42 = vld [vmem:[%s2954_s0 + $0x140] sm:$0xff] }
  0x17   :  { %v172_v61 = vadd.f32 %v171_v45, %v170_v35  ;;  %v179_v63 = vadd.f32 %v178_v46, %v177_v37  ;;  %v2400_v25 = vadd.f32 %v127_v52, %v126_v39  ;;  %v150_v27 = vrot.slane %v149_v54, 1 }
  0x18   :  { %v2398_v19 = vadd.f32 %v113_v51, %v112_v38  ;;  %v136_v26 = vrot.slane %v135_v53, 1  ;;  %v158_v31 = vadd.f32 %v157_v60, %v156_v44  ;;  %v191_v34 = vadd.f32 %v68_v50, %v65_v49  ;;  %v81_v50 = vld [vmem:[%s2954_s0 + $0x148] sm:$0xff] }
  0x19   :  { %v173_v32 = vrot.slane %v172_v61, 1  ;;  %v180_v33 = vrot.slane %v179_v63, 2  ;;  %v2414_v37 = vadd.f32 %v150_v27, %v149_v54  ;;  %v198_v38 = vsel %vm105_vm0, %v66_v56, 0.0  ;;  %v2440_v56 = vld [vmem:[%s2952_s2 + $0x110] ss:$8 sps:$4 sm:$0xff]  }
  0x1a   :  { %v2412_v35 = vadd.f32 %v136_v26, %v135_v53  ;;  %v199_v39 = vsel %vm105_vm0, %v69_v58, 0.0  ;;  %v159_v44 = vrot.slane %v158_v31, 1  ;;  %v192_v49 = vrot.slane %v191_v34, 4  ;;  %2972 = vst [vmem:[#allocation6_spill] sm:$0xff] %v2440_v56  ;;  %v84_v26 = vld [vmem:[%s2954_s0 + $0x160] sm:$0xff]  ;;  %v86_v27 = vld [vmem:[%s2954_s0 + $0x170] sm:$0xff] }
  0x1b   :  { %648 = vmatpush1.bf16.xpose.msra.mxu0 %v2238_v15  ;;  %v2428_v45 = vadd.f32 %v173_v32, %v172_v61  ;;  %v181_v46 = vadd.f32 %v180_v33, %v179_v63  ;;  %v200_v51 = vadd.f32 %v199_v39, %v198_v38  ;;  %v214_v52 = vadd.f32 %v74_v29, %v71_v18  ;;  %v83_v18 = vld [vmem:[%s2954_s0 + $0x158] sm:$0xff]  ;;  %v2457_v32 = vld [vmem:[%s2952_s2 + $0x104] ss:$8 sps:$4 sm:$0xff]  }
  0x1c   :  { %649 = vmatprep.subr.bf16.mxu0 %v2243_v16  ;;  %689 = vmatpush1.bf16.xpose.msra.mxu1 %v2258_v20  ;;  %v221_v53 = vsel %vm105_vm0, %v72_v28, 0.0  ;;  %v222_v54 = vsel %vm105_vm0, %v75_v30, 0.0  ;;  %v2442_v58 = vadd.f32 %v159_v44, %v158_v31  ;;  %v193_v61 = vadd.f32 %v192_v49, %v191_v34  ;;  %2973 = vst [vmem:[#allocation7_spill] sm:$0xff] %v2457_v32  ;;  %v2465_v44 = vld [vmem:[%s2952_s2] ss:$8 sps:$4 sm:$0xff]  }
  0x1d   :  { %690 = vmatprep.subr.bf16.mxu1 %v2263_v21  ;;  %v182_v60 = vrot.slane %v181_v46, 1  ;;  %v223_v63 = vadd.f32 %v222_v54, %v221_v53  ;;  %v201_v28 = vrot.slane %v200_v51, 4  ;;  %v215_v29 = vrot.slane %v214_v52, 4 }
  0x1e   :  { %v237_v30 = vadd.f32 %v80_v42, %v77_v40  ;;  %v244_v31 = vsel %vm105_vm0, %v78_v41, 0.0  ;;  %v194_v34 = vrot.slane %v193_v61, 2  ;;  %v245_v39 = vsel %vm105_vm0, %v81_v50, 0.0  ;;  %v87_v40 = vld [vmem:[%s2954_s0 + $0x178] sm:$0xff] }
  0x1f   :  { %v2459_v33 = vadd.f32 %v182_v60, %v181_v46  ;;  %v224_v38 = vrot.slane %v223_v63, 4  ;;  %v202_v41 = vadd.f32 %v201_v28, %v200_v51  ;;  %v216_v42 = vadd.f32 %v215_v29, %v214_v52  ;;  %v2473_v46 = vld [vmem:[%s2952_s2 + $0xf4] ss:$8 sps:$4 sm:$0xff]  }
  0x20   :  { %v238_v49 = vrot.slane %v237_v30, 4  ;;  %v246_v53 = vadd.f32 %v245_v39, %v244_v31  ;;  %v195_v50 = vadd.f32 %v194_v34, %v193_v61  ;;  %v260_v60 = vadd.f32 %v86_v27, %v83_v18 }
  0x21   :  { %v225_v54 = vadd.f32 %v224_v38, %v223_v63  ;;  %v267_v14 = vsel %vm105_vm0, %v84_v26, 0.0  ;;  %v268_v39 = vsel %vm105_vm0, %v87_v40, 0.0 }
  0x22   :  { %v239_v51 = vadd.f32 %v238_v49, %v237_v30  ;;  %v247_v52 = vrot.slane %v246_v53, 4  ;;  %v196_v28 = vrot.slane %v195_v50, 1  ;;  %v261_v31 = vrot.slane %v260_v60, 4  ;;  %v2484_v49 = vld [vmem:[%s2952_s2 + $0x100] ss:$8 sps:$4 sm:$0xff]  }
  0x23   :  { %650 = vmatpush1.bf16.xpose.msra.mxu0 %v2268_v23  ;;  %v226_v29 = vrot.slane %v225_v54, 2  ;;  %v269_v38 = vadd.f32 %v268_v39, %v267_v14  ;;  %v2492_v14 = vld [vmem:[%s2952_s2 + $0xf0] ss:$8 sps:$4 sm:$0xff]  }
  0x24   :  { %651 = vmatprep.subr.bf16.mxu0 %v2273_v24  ;;  %691 = vmatpush1.bf16.xpose.msra.mxu1 %v2304_v36  ;;  %v240_v18 = vrot.slane %v239_v51, 2  ;;  %v248_v26 = vadd.f32 %v247_v52, %v246_v53  ;;  %v197_v27 = vadd.f32 %v196_v28, %v195_v50  ;;  %v262_v34 = vadd.f32 %v261_v31, %v260_v60 }
  0x25   :  { %692 = vmatprep.subr.bf16.mxu1 %v2342_v57  ;;  %v227_v30 = vadd.f32 %v226_v29, %v225_v54 }
  0x26   :  { %v249_v57 = vrot.slane %v248_v26, 2 }
  0x28   :  { %v250_v60 = vadd.f32 %v249_v57, %v248_v26 }
  0x2a   :  { %v251_v31 = vrot.slane %v250_v60, 1 }
  0x2b   :  { %652 = vmatpush1.bf16.xpose.msra.mxu0 %v2349_v62 }
  0x2c   :  { %653 = vmatprep.subr.bf16.mxu0 %v2354_v22  ;;  %693 = vmatpush1.bf16.xpose.msra.mxu1 %v2369_v48  ;;  %v217_v48 = vrot.slane %v216_v42, 2 }
  0x2d   :  { %694 = vmatprep.subr.bf16.mxu1 %v2380_v55  ;;  %v203_v55 = vrot.slane %v202_v41, 2 }
  0x2e   :  { %v218_v63 = vadd.f32 %v217_v48, %v216_v42  ;;  %v263_v48 = vrot.slane %v262_v34, 2  ;;  %v314_v42 = vsel %vm300_vm1, %v2400_v25, %v2388_v59  ;;  %v40_v25 = vld [vmem:[%s2954_s0] sm:$0xff] }
  0x2f   :  { %v204_v61 = vadd.f32 %v203_v55, %v202_v41  ;;  %v228_v55 = vrot.slane %v227_v30, 1  ;;  %v270_v41 = vrot.slane %v269_v38, 4  ;;  %v315_v59 = vsel %vm302_vm2, %v2414_v37, %v314_v42  ;;  %v46_v37 = vld [vmem:[%s2954_s0 + $0x30] sm:$0xff] }
  0x30   :  { %v219_v40 = vrot.slane %v218_v63, 1  ;;  %v264_v28 = vadd.f32 %v263_v48, %v262_v34  ;;  %v316_v39 = vsel %vm304_vm3, %v2428_v45, %v315_v59  ;;  %v49_v45 = vld [vmem:[%s2954_s0 + $0x48] sm:$0xff] }
  0x31   :  { %v229_v52 = vadd.f32 %v228_v55, %v227_v30  ;;  %v271_v29 = vadd.f32 %v270_v41, %v269_v38  ;;  %v317_v26 = vsel %vm306_vm4, %v197_v27, %v316_v39  ;;  %v58_v30 = vld [vmem:[%s2954_s0 + $0x90] sm:$0xff]  ;;  %v61_v34 = vld [vmem:[%s2954_s0 + $0xa8] sm:$0xff] }
  0x32   :  { %v220_v50 = vadd.f32 %v219_v40, %v218_v63  ;;  %v265_v63 = vrot.slane %v264_v28, 1 }
  0x33   :  { %654 = vmatpush1.bf16.xpose.msra.mxu0 %v2364_v47 }
  0x34   :  { %655 = vmatprep.subr.bf16.mxu0 %v2393_v17  ;;  %695 = vmatpush1.bf16.xpose.msra.mxu1 %v2440_v56  ;;  %v241_v56 = vadd.f32 %v240_v18, %v239_v51  ;;  %v2497_v51 = vld [vmem:[%s2952_s2 + $0xe4] ss:$8 sps:$4 sm:$0xff]   ;;  %v272_v18 = vrot.slane %v271_v29, 2  ;;  %v318_v27 = vsel %vm308_vm5, %v220_v50, %v317_v26  ;;  %v266_v40 = vadd.f32 %v265_v63, %v264_v28  ;;  %v67_v50 = vld [vmem:[%s2954_s0 + $0xd8] sm:$0xff] }
  0x35   :  { %696 = vmatprep.subr.bf16.mxu1 %v2457_v32  ;;  %v205_v32 = vrot.slane %v204_v61, 1  ;;  %v79_v26 = vld [vmem:[%s2954_s0 + $0x138] sm:$0xff] }
  0x36   :  { %v242_v54 = vrot.slane %v241_v56, 1  ;;  %v273_v55 = vadd.f32 %v272_v18, %v271_v29  ;;  %v76_v18 = vld [vmem:[%s2954_s0 + $0x120] sm:$0xff] }
  0x37   :  { %v206_v53 = vadd.f32 %v205_v32, %v204_v61  ;;  %v43_v32 = vld [vmem:[%s2954_s0 + $0x18] sm:$0xff]  ;;  %v321_v61 = vsel %vm300_vm1, %v2412_v35, %v2398_v19  ;;  %v52_v19 = vld [vmem:[%s2954_s0 + $0x60] sm:$0xff] }
  0x38   :  { %v243_v57 = vadd.f32 %v242_v54, %v241_v56  ;;  %v322_v56 = vsel %vm302_vm2, %v2442_v58, %v321_v61  ;;  %v55_v35 = vld [vmem:[%s2954_s0 + $0x78] sm:$0xff]  ;;  %v91_v38 = vadd.f32 %v43_v32, %v40_v25  ;;  %v70_v54 = vld [vmem:[%s2954_s0 + $0xf0] sm:$0xff]  ;;  %v274_v59 = vrot.slane %v273_v55, 1 }
  0x39   :  { %v323_v58 = vsel %vm304_vm3, %v2459_v33, %v322_v56  ;;  %v64_v33 = vld [vmem:[%s2954_s0 + $0xc0] sm:$0xff]  ;;  %v138_v29 = vadd.f32 %v55_v35, %v52_v19  ;;  %v161_v32 = vadd.f32 %v61_v34, %v58_v30 }
  0x3a   :  { %v319_v48 = vsel %vm310_vm6, %v243_v57, %v318_v27  ;;  %v324_v41 = vsel %vm306_vm4, %v206_v53, %v323_v58  ;;  %v92_v28 = vrot.slane %v91_v38, 4  ;;  %v115_v53 = vadd.f32 %v49_v45, %v46_v37  ;;  %v2562_v57 = vld [vmem:[%s2952_s2 + $0xe0] ss:$8 sps:$4 sm:$0xff]   ;;  %v2567_v37 = vld [vmem:[%s2952_s2 + $0xd4] ss:$8 sps:$4 sm:$0xff]  }
  0x3b   :  { %656 = vmatpush1.bf16.xpose.msra.mxu0 %v2465_v44  ;;  %v325_v42 = vsel %vm308_vm5, %v229_v52, %v324_v41  ;;  %v2556_v25 = vsel %vm312_vm7, %v266_v40, %v319_v48  ;;  %v139_v61 = vrot.slane %v138_v29, 4  ;;  %v275_v63 = vadd.f32 %v274_v59, %v273_v55  ;;  %v85_v27 = vld [vmem:[%s2954_s0 + $0x168] sm:$0xff] }
  0x3c   :  { %657 = vmatprep.subr.bf16.mxu0 %v2473_v46  ;;  %697 = vmatpush1.bf16.xpose.msra.mxu1 %v2484_v49  ;;  %v116_v39 = vrot.slane %v115_v53, 4  ;;  %v162_v56 = vrot.slane %v161_v32, 4  ;;  %v184_v45 = vadd.f32 %v67_v50, %v64_v33  ;;  %v726_v35 = vpack.c.bf16 %v2556_v25, %v2556_v25 }
  0x3d   :  { %728 = vmatprep.subr.bf16.mxu1 %v2155_v0  ;;  %v252_v0 = vadd.f32 %v251_v31, %v250_v60  ;;  %v73_v60 = vld [vmem:[%s2954_s0 + $0x108] sm:$0xff]  ;;  %v93_v31 = vadd.f32 %v92_v28, %v91_v38  ;;  %v140_v34 = vadd.f32 %v139_v61, %v138_v29  ;;  %v2594_v61 = vld [vmem:[%s2952_s2 + $0xd0] ss:$8 sps:$4 sm:$0xff]  }
  0x3e   :  { %v207_v19 = vadd.f32 %v73_v60, %v70_v54  ;;  %v117_v30 = vadd.f32 %v116_v39, %v115_v53  ;;  %v163_v40 = vadd.f32 %v162_v56, %v161_v32 }
  0x3f   :  { %v326_v52 = vsel %vm310_vm6, %v252_v0, %v325_v42  ;;  %v82_v0 = vld [vmem:[%s2954_s0 + $0x150] sm:$0xff]  ;;  %v94_v58 = vrot.slane %v93_v31, 2  ;;  %v141_v33 = vrot.slane %v140_v34, 2  ;;  %v230_v42 = vadd.f32 %v79_v26, %v76_v18 }
  0x40   :  { %v327_v38 = vsel %vm312_vm7, %v275_v63, %v326_v52  ;;  %v208_v55 = vrot.slane %v207_v19, 4  ;;  %v118_v41 = vrot.slane %v117_v30, 2  ;;  %v164_v50 = vrot.slane %v163_v40, 2 }
  0x41   :  { %v95_v48 = vadd.f32 %v94_v58, %v93_v31  ;;  %v253_v28 = vadd.f32 %v85_v27, %v82_v0  ;;  %v142_v29 = vadd.f32 %v141_v33, %v140_v34  ;;  %v231_v59 = vrot.slane %v230_v42, 4  ;;  %336 = vst.msk [vmem:[#allocation2 + $0x10] sm:$0xff] %vm105_vm0, %v327_v38  ;;  %v1994_v38 = vld [vmem:[%s2952_s2 + $0xc0] ss:$8 sps:$4 sm:$0xff]  }
  0x42   :  { %v209_v60 = vadd.f32 %v208_v55, %v207_v19  ;;  %v119_v53 = vadd.f32 %v118_v41, %v117_v30  ;;  %v165_v52 = vadd.f32 %v164_v50, %v163_v40 }
  0x43   :  { %658 = vmatpush2.bf16.xpose.msra.mxu0 %v2492_v14  ;;  %715 = vmatmul.mubr.bf16.vlgmr.msra.gmra.mxu1 %v2317_v43  ;;  %v254_v39 = vrot.slane %v253_v28, 4  ;;  %v143_v26 = vrot.slane %v142_v29, 1  ;;  %v232_v56 = vadd.f32 %v231_v59, %v230_v42  ;;  %v1999_v59 = vld [vmem:[%s2952_s2 + $0xb0] ss:$8 sps:$4 sm:$0xff]  }
  0x44   :  { %659 = vmatprep.subr.bf16.mxu0 %v2497_v51  ;;  %729 = vmatpush1.bf16.msra.mxu1 %v2160_v1  ;;  %v185_v1 = vrot.slane %v184_v45, 4  ;;  %v210_v31 = vrot.slane %v209_v60, 2  ;;  %v120_v18 = vrot.slane %v119_v53, 1 }
  0x45   :  { %730 = vmatprep.subr.bf16.mxu1 %v2166_v2  ;;  %760 = vmatprep.mubr.bf16.mxu1 %v726_v35  ;;  %v96_v2 = vrot.slane %v95_v48, 1  ;;  %v255_v35 = vadd.f32 %v254_v39, %v253_v28  ;;  %v144_v27 = vadd.f32 %v143_v26, %v142_v29  ;;  %v233_v58 = vrot.slane %v232_v56, 2 }
  0x46   :  { %v186_v54 = vadd.f32 %v185_v1, %v184_v45  ;;  %v166_v45 = vrot.slane %v165_v52, 1  ;;  %v121_v0 = vadd.f32 %v120_v18, %v119_v53  ;;  %v1997_v53 = vld [vmem:[%s2952_s2 + $0xb4] ss:$8 sps:$4 sm:$0xff]  }
  0x47   :  { %v97_v63 = vadd.f32 %v96_v2, %v95_v48  ;;  %v256_v1 = vrot.slane %v255_v35, 2  ;;  %v234_v55 = vadd.f32 %v233_v58, %v232_v56 }
  0x48   :  { %731 = vmatpush1.bf16.msra.mxu1 %v2183_v5  ;;  %v187_v32 = vrot.slane %v186_v54, 2  ;;  %v1992_v5 = vld [vmem:[%s2952_s2 + $0xc4] ss:$8 sps:$4 sm:$0xff]   ;;  %v167_v30 = vadd.f32 %v166_v45, %v165_v52 }
  0x49   :  { %732 = vmatprep.subr.bf16.mxu1 %v2188_v6  ;;  %v211_v6 = vadd.f32 %v210_v31, %v209_v60  ;;  %v301_v48 = vsel %vm300_vm1, %v121_v0, %v97_v63 }
  0x4a   :  { %v188_v19 = vadd.f32 %v187_v32, %v186_v54  ;;  %v303_v42 = vsel %vm302_vm2, %v144_v27, %v301_v48  ;;  %v2010_v48 = vld [vmem:[%s2955_s4 + $0x38] sm:$0xff]  }
  0x4b   :  { %660 = vmatpush2.bf16.xpose.msra.mxu0 %v2562_v57  ;;  %v212_v40 = vrot.slane %v211_v6, 1  ;;  %v305_v50 = vsel %vm304_vm3, %v167_v30, %v303_v42  ;;  %v2014_v42 = vld [vmem:[%s2955_s4 + $0x30] sm:$0xff]  }
  0x4c   :  { %661 = vmatprep.subr.bf16.mxu0 %v2567_v37  ;;  %733 = vmatpush1.bf16.msra.mxu1 %v2213_v10  ;;  %v189_v34 = vrot.slane %v188_v19, 1  ;;  %v257_v10 = vadd.f32 %v256_v1, %v255_v35 }
  0x4d   :  { %734 = vmatprep.subr.bf16.mxu1 %v2218_v11  ;;  %v213_v33 = vadd.f32 %v212_v40, %v211_v6  ;;  %v235_v11 = vrot.slane %v234_v55, 1 }
  0x4e   :  { %v190_v41 = vadd.f32 %v189_v34, %v188_v19  ;;  %v258_v54 = vrot.slane %v257_v10, 1 }
  0x4f   :  { %v236_v28 = vadd.f32 %v235_v11, %v234_v55  ;;  %v2009_v55 = vld [vmem:[%s2955_s4 + $0x78] sm:$0xff]   ;;  %v2015_v11 = vld [vmem:[%s2956_s3 + $0x70] sm:$0xff]  }
  0x50   :  { %735 = vmatpush1.bf16.msra.mxu1 %v2238_v15  ;;  %v307_v60 = vsel %vm306_vm4, %v190_v41, %v305_v50  ;;  %v259_v15 = vadd.f32 %v258_v54, %v257_v10  ;;  %v2011_v41 = vld [vmem:[%s2956_s3 + $0x78] sm:$0xff]  }
  0x51   :  { %736 = vmatprep.subr.bf16.mxu1 %v2243_v16  ;;  %v309_v2 = vsel %vm308_vm5, %v213_v33, %v307_v60  ;;  %v2012_v33 = vld [vmem:[%s2955_s4 + $0x70] sm:$0xff]   ;;  %v2013_v10 = vld [vmem:[%s2956_s3 + $0x38] sm:$0xff]  }
  0x52   :  { %v311_v29 = vsel %vm310_vm6, %v236_v28, %v309_v2 }
  0x53   :  { %662 = vmatpush2.bf16.xpose.msra.mxu0 %v2594_v61  ;;  %v2620_v16 = vsel %vm312_vm7, %v259_v15, %v311_v29 }
  0x54   :  { %663 = vmatprep.subr.bf16.mxu0 %v1992_v5  ;;  %737 = vmatpush1.bf16.msra.mxu1 %v2268_v23  ;;  %v2000_v23 = vld [vmem:[%s2952_s2 + $0xa4] ss:$8 sps:$4 sm:$0xff]  }
  0x55   :  { %738 = vmatprep.subr.bf16.mxu1 %v2273_v24  ;;  %v2002_v24 = vld [vmem:[%s2952_s2 + $0xa0] ss:$8 sps:$4 sm:$0xff]  }
  0x58   :  { %739 = vmatpush1.bf16.msra.mxu1 %v2349_v62  ;;  %v2003_v62 = vld [vmem:[%s2952_s2 + $0x94] ss:$8 sps:$4 sm:$0xff]  }
  0x59   :  { %740 = vmatprep.subr.bf16.mxu1 %v2354_v22  ;;  %v2005_v22 = vld [vmem:[%s2952_s2 + $0x90] ss:$8 sps:$4 sm:$0xff]  }
  0x5b   :  { %664 = vmatpush2.bf16.xpose.msra.mxu0 %v1994_v38 }
  0x5c   :  { %665 = vmatprep.subr.bf16.mxu0 %v1997_v53  ;;  %741 = vmatpush1.bf16.msra.mxu1 %v2364_v47  ;;  %v2006_v47 = vld [vmem:[%s2952_s2 + $0x84] ss:$8 sps:$4 sm:$0xff]  }
  0x5d   :  { %742 = vmatprep.subr.bf16.mxu1 %v2393_v17  ;;  %v2008_v17 = vld [vmem:[%s2952_s2 + $0x80] ss:$8 sps:$4 sm:$0xff]  }
  0x60   :  { %743 = vmatpush1.bf16.msra.mxu1 %v2465_v44  ;;  %v2100_v44 = vmov 0  }
  0x61   :  { %744 = vmatprep.subr.bf16.mxu1 %v2473_v46  ;;  %v725_v46 = vpack.c.bf16 %v2620_v16, %v2620_v16 }
  0x63   :  { %666 = vmatpush2.bf16.xpose.msra.mxu0 %v1999_v59 }
  0x64   :  { %667 = vmatprep.subr.bf16.mxu0 %v2000_v23  ;;  %745 = vmatpush2.bf16.msra.mxu1 %v2492_v14 }
  0x65   :  { %746 = vmatprep.subr.bf16.mxu1 %v2497_v51 }
  0x68   :  { %747 = vmatpush2.bf16.msra.mxu1 %v2562_v57 }
  0x69   :  { %748 = vmatprep.subr.bf16.mxu1 %v2567_v37 }
  0x6b   :  { %668 = vmatpush2.bf16.xpose.msra.mxu0 %v2002_v24 }
  0x6c   :  { %669 = vmatprep.subr.bf16.mxu0 %v2003_v62  ;;  %749 = vmatpush2.bf16.msra.mxu1 %v2594_v61 }
  0x6d   :  { %750 = vmatprep.subr.bf16.mxu1 %v1992_v5  ;;  %v812_v5 = vlaneseq }
  0x6f   :  { %v813_v45 = vand.u32 127, %v812_v5 }
  0x70   :  { %751 = vmatpush2.bf16.msra.mxu1 %v1994_v38 }
  0x71   :  { %752 = vmatprep.subr.bf16.mxu1 %v1997_v53  ;;  %v815_v6 = vadd.s32 256, %v813_v45  ;;  %v2038_v45 = vld [vmem:[%s2955_s4] sm:$0xff]  }
  0x73   :  { %670 = vmatpush2.bf16.xpose.msra.mxu0 %v2005_v22  ;;  %vm818_vm8 = vcmp.lt.s32.totalorder %v815_v6, 300  ;;  %v2040_v6 = vld [vmem:[%s2956_s3] sm:$0xff]  }
  0x74   :  { %671 = vmatprep.subr.bf16.mxu0 %v2006_v47  ;;  %753 = vmatpush2.bf16.msra.mxu1 %v1999_v59 }
  0x75   :  { %754 = vmatprep.subr.bf16.mxu1 %v2000_v23 }
  0x78   :  { %755 = vmatpush2.bf16.msra.mxu1 %v2002_v24 }
  0x79   :  { %756 = vmatprep.subr.bf16.mxu1 %v2003_v62 }
  0x7b   :  { %672 = vmatpush2.bf16.xpose.msra.mxu0 %v2008_v17 }
  0x7c   :  { %769 = vmatprep.subr.bf16.mxu0 %v2173_v3  ;;  %757 = vmatpush2.bf16.msra.mxu1 %v2005_v22  ;;  %v2974_v3 = vld [vmem:[#allocation3_spill] sm:$0xff] }
  0x7d   :  { %758 = vmatprep.subr.bf16.mxu1 %v2006_v47 }
  0x80   :  { %759 = vmatpush2.bf16.msra.mxu1 %v2008_v17 }
  0x81   :  { %1772 = vmatprep.subr.bf16.mxu1 %v2009_v55  ;;  %v2097_v55 = vld [vmem:[%s2953_s1] sm:$0xff] }
  0x82   :  { %674 = vmatmul.mubr.bf16.vlgmr.msra.gmra.mxu0 %v2317_v43  ;;  %v2978_v43 = vld [vmem:[#allocation7_spill] sm:$0xff] }
  0x83   :  { %770 = vmatpush1.bf16.msra.mxu0 %v2178_v4  ;;  %801 = vmatprep.mubr.bf16.mxu0 %v2100_v44  ;;  %v2975_v4 = vld [vmem:[#allocation4_spill] sm:$0xff] }
  0x84   :  { %771 = vmatprep.subr.bf16.mxu0 %v2194_v7  ;;  %761 = vmatmul.mubr.bf16.vlgmr.msra.gmra.mxu1 %v725_v46  ;;  %v2976_v7 = vld [vmem:[#allocation5_spill] sm:$0xff] }
  0x85   :  { %1773 = vmatpush3.bf16.msra.mxu1 %v2010_v48 }
  0x86   :  { %1774 = vmatprep.subr.bf16.mxu1 %v2012_v33 }
  0x87   :  { %772 = vmatpush1.bf16.msra.mxu0 %v2203_v8  ;;  %v2977_v8 = vld [vmem:[#allocation6_spill] sm:$0xff] }
  0x88   :  { %773 = vmatprep.subr.bf16.mxu0 %v2208_v9  ;;  %v2671_v9 = vld [vmem:[#allocation2 + $0x10] sm:$0xff] }
  0x89   :  { %1775 = vmatpush3.bf16.msra.mxu1 %v2014_v42 }
  0x8b   :  { %774 = vmatpush1.bf16.msra.mxu0 %v2227_v12  ;;  %v727_v12 = vpack.c.bf16 %v2671_v9, %v2671_v9 }
  0x8c   :  { %775 = vmatprep.subr.bf16.mxu0 %v2232_v13 }
  0x8f   :  { %776 = vmatpush1.bf16.msra.mxu0 %v2258_v20 }
  0x90   :  { %777 = vmatprep.subr.bf16.mxu0 %v2263_v21 }
  0x93   :  { %778 = vmatpush1.bf16.msra.mxu0 %v2304_v36 }
  0x94   :  { %779 = vmatprep.subr.bf16.mxu0 %v2974_v3 }
  0x97   :  { %780 = vmatpush1.bf16.msra.mxu0 %v2975_v4 }
  0x98   :  { %781 = vmatprep.subr.bf16.mxu0 %v2976_v7  ;;  %v2016_v7 = vld [vmem:[%s2955_s4 + $0x68] sm:$0xff]  }
  0x99   :  { %1776 = vmatprep.subr.bf16.mxu1 %v2016_v7  ;;  %v2053_v7 = vld [vmem:[%s2957_s5 + $0x18] sm:$0xff]  }
  0x9b   :  { %782 = vmatpush1.bf16.msra.mxu0 %v2977_v8  ;;  %v2017_v8 = vld [vmem:[%s2956_s3 + $0x30] sm:$0xff]  }
  0x9c   :  { %783 = vmatprep.subr.bf16.mxu0 %v2978_v43  ;;  %v2018_v43 = vld [vmem:[%s2955_s4 + $0x28] sm:$0xff]  }
  0x9d   :  { %1777 = vmatpush3.bf16.msra.mxu1 %v2018_v43  ;;  %v2055_v43 = vld [vmem:[%s2957_s5 + $0x8] sm:$0xff]  }
  0x9f   :  { %784 = vmatpush1.bf16.msra.mxu0 %v2484_v49 }
  0xa0   :  { %1794 = vmatprep.subr.bf16.mxu0 %v2011_v41  ;;  %v2098_v41 = vld [vmem:[%s2953_s1 + $0x8] sm:$0xff] }
  0xa2   :  { %802 = vmatmul.mubr.bf16.vlgmr.msra.gmra.mxu0 %v727_v12  ;;  %v2019_v12 = vld [vmem:[%s2956_s3 + $0x68] sm:$0xff]  }
  0xa3   :  { %1795 = vmatpush3.bf16.msra.mxu0 %v2013_v10 }
  0xa4   :  { %1796 = vmatprep.subr.bf16.mxu0 %v2015_v11 }
  0xa7   :  { %1797 = vmatpush3.bf16.msra.mxu0 %v2017_v8  ;;  %v2054_v8 = vld [vmem:[%s2957_s5 + $0x10] sm:$0xff]  }
  0xa8   :  { %1798 = vmatprep.subr.bf16.mxu0 %v2019_v12  ;;  %v2056_v12 = vld [vmem:[%s2957_s5] sm:$0xff]  }
 0x103   :  { %v716_v13 = vpop.f32.mrf.mxu1 }
 0x105   :  { %v718_v20 = vpop.f32.mrf.mxu1 }
 0x106   :  { %v2021_v20 = vld [vmem:[%s2956_s3 + $0x28] sm:$0xff]  }
 0x107   :  { %v719_v21 = vpop.f32.mrf.mxu1  ;;  %1799 = vmatpush3.bf16.msra.mxu0 %v2021_v20  ;;  %v2058_v20 = vld [vmem:[%s2958_s6 + $0x30] sm:$0xff]  }
 0x108   :  { %v2022_v21 = vld [vmem:[%s2955_s4 + $0x20] sm:$0xff]  }
 0x109   :  { %v720_v36 = vpop.f32.mrf.mxu1 }
 0x10a   :  { %v2023_v36 = vld [vmem:[%s2956_s3 + $0x60] sm:$0xff]  }
 0x10b   :  { %1800 = vmatprep.subr.bf16.mxu0 %v2023_v36  ;;  %v2060_v36 = vld [vmem:[%s2958_s6 + $0x20] sm:$0xff]  }
 0x142   :  { %v675_v14 = vpop.f32.mrf.mxu0 }
 0x143   :  { %2073 = vtanh.f32 %v675_v14  ;;  %v2024_v14 = vld [vmem:[%s2955_s4 + $0x58] sm:$0xff]  }
 0x144   :  { %v677_v51 = vpop.f32.mrf.mxu0  ;;  %v762_v52 = vpop.f32.mrf.mxu1 }
 0x145   :  { %2075 = vtanh.f32 %v677_v51  ;;  %v2025_v51 = vld [vmem:[%s2956_s3 + $0x20] sm:$0xff]  }
 0x146   :  { %v679_v57 = vpop.f32.mrf.mxu0  ;;  %v764_v32 = vpop.f32.mrf.mxu1  ;;  %1801 = vmatpush3.bf16.msra.mxu0 %v2025_v51  ;;  %v2062_v51 = vld [vmem:[%s2958_s6 + $0x10] sm:$0xff]  }
 0x147   :  { %v2026_v57 = vld [vmem:[%s2955_s4 + $0x18] sm:$0xff]  }
 0x148   :  { %v680_v37 = vpop.f32.mrf.mxu0  ;;  %v766_v31 = vpop.f32.mrf.mxu1 }
 0x149   :  { %v2027_v37 = vld [vmem:[%s2956_s3 + $0x58] sm:$0xff]   ;;  %v2030_v31 = vld [vmem:[%s2955_s4 + $0x10] sm:$0xff]  }
 0x14a   :  { %v767_v39 = vpop.f32.mrf.mxu1  ;;  %1802 = vmatprep.subr.bf16.mxu0 %v2027_v37 }
 0x14b   :  { %v2031_v39 = vld [vmem:[%s2956_s3 + $0x50] sm:$0xff]  }
 0x150   :  { %v2074_v19 = vpop.eup %2073 }
 0x152   :  { %v2076_v35 = vpop.eup %2075 }
 0x153   :  { %v822_v34 = vmax.f32 %v2074_v19, %v2076_v35 }
 0x162   :  { %v803_v61 = vpop.f32.mrf.mxu0 }
 0x163   :  { %v804_v63 = vadd.f32 %v803_v61, %v762_v52  ;;  %v2028_v52 = vld [vmem:[%s2955_s4 + $0x50] sm:$0xff]   ;;  %v2032_v61 = vld [vmem:[%s2955_s4 + $0x48] sm:$0xff]  }
 0x164   :  { %v805_v18 = vpop.f32.mrf.mxu0 }
 0x165   :  { %v806_v26 = vadd.f32 %v805_v18, %v764_v32  ;;  %2077 = vtanh.f32 %v804_v63  ;;  %v2029_v32 = vld [vmem:[%s2956_s3 + $0x18] sm:$0xff]   ;;  %v2033_v63 = vld [vmem:[%s2956_s3 + $0x10] sm:$0xff]   ;;  %v2034_v18 = vld [vmem:[%s2955_s4 + $0x8] sm:$0xff]  }
 0x166   :  { %v807_v49 = vpop.f32.mrf.mxu0  ;;  %1803 = vmatpush3.bf16.msra.mxu0 %v2029_v32 }
 0x167   :  { %2079 = vtanh.f32 %v806_v26  ;;  %1804 = vmatprep.subr.bf16.mxu0 %v2031_v39  ;;  %v2035_v26 = vld [vmem:[%s2956_s3 + $0x48] sm:$0xff]   ;;  %v2036_v49 = vld [vmem:[%s2955_s4 + $0x40] sm:$0xff]  }
 0x168   :  { %2081 = vtanh.f32 %v716_v13  ;;  %v808_v56 = vpop.f32.mrf.mxu0  ;;  %v2020_v13 = vld [vmem:[%s2955_s4 + $0x60] sm:$0xff]  }
 0x169   :  { %1778 = vmatprep.subr.bf16.mxu1 %v2020_v13  ;;  %v2037_v56 = vld [vmem:[%s2956_s3 + $0x8] sm:$0xff]   ;;  %v2057_v13 = vld [vmem:[%s2958_s6 + $0x38] sm:$0xff]  }
 0x16a   :  { %1779 = vmatpush3.bf16.msra.mxu1 %v2022_v21  ;;  %1805 = vmatpush3.bf16.msra.mxu0 %v2033_v63  ;;  %v2059_v21 = vld [vmem:[%s2958_s6 + $0x28] sm:$0xff]  }
 0x16b   :  { %1780 = vmatprep.subr.bf16.mxu1 %v2024_v14  ;;  %1806 = vmatprep.subr.bf16.mxu0 %v2035_v26  ;;  %v2061_v14 = vld [vmem:[%s2958_s6 + $0x18] sm:$0xff]   ;;  %v2904_v26 = vshrl.u32 %v812_v5, 7  ;;  %v2064_v5 = vld [vmem:[%s2958_s6] sm:$0xff]  }
 0x16e   :  { %1781 = vmatpush3.bf16.msra.mxu1 %v2026_v57  ;;  %1807 = vmatpush3.bf16.msra.mxu0 %v2037_v56  ;;  %v2063_v57 = vld [vmem:[%s2958_s6 + $0x8] sm:$0xff]   ;;  %v1323_v56 = vsub.s32 0, %v2904_v26 }
 0x16f   :  { %1782 = vmatprep.subr.bf16.mxu1 %v2028_v52 }
 0x172   :  { %v2078_v0 = vpop.eup %2077  ;;  %1783 = vmatpush3.bf16.msra.mxu1 %v2030_v31 }
 0x173   :  { %1784 = vmatprep.subr.bf16.mxu1 %v2032_v61 }
 0x174   :  { %v2080_v27 = vpop.eup %2079 }
 0x175   :  { %v2082_v58 = vpop.eup %2081  ;;  %v846_v30 = vmax.f32 %v2078_v0, %v2080_v27 }
 0x176   :  { %v821_v40 = vsel %vm818_vm8, %v2082_v58, -inf  ;;  %1785 = vmatpush3.bf16.msra.mxu1 %v2034_v18 }
 0x177   :  { %847 = vmax.xlane.f32.xlu0 %v846_v30  ;;  %v823_v1 = vmax.f32 %v822_v34, %v821_v40  ;;  %1786 = vmatprep.subr.bf16.mxu1 %v2036_v49 }
 0x17a   :  { %1787 = vmatpush3.bf16.msra.mxu1 %v2038_v45  ;;  %v869_v45 = vld [vmem:[%s2959_s8] sm:$0xf] }
 0x17b   :  { %824 = vmax.xlane.f32.xlu0 %v823_v1 }
 0x200   :  { %v848_v50 = vpop.xlane.xlu0 %847 }
 0x201   :  { %v849_v54 = vsub.f32 %v2078_v0, %v848_v50  ;;  %v850_v60 = vsub.f32 %v2080_v27, %v848_v50 }
 0x203   :  { %v851_v38 = vmul.f32 1.442695, %v849_v54  ;;  %v853_v28 = vmul.f32 1.442695, %v850_v60 }
 0x204   :  { %v825_v2 = vpop.xlane.xlu0 %824 }
 0x205   :  { %2083 = vpow2.f32 %v851_v38  ;;  %v826_v53 = vsub.f32 %v2074_v19, %v825_v2  ;;  %v827_v15 = vsub.f32 %v2076_v35, %v825_v2  ;;  %v828_v29 = vsub.f32 %v821_v40, %v825_v2  ;;  %v2039_v19 = vld [vmem:[%s2956_s3 + $0x40] sm:$0xff]  }
 0x206   :  { %2085 = vpow2.f32 %v853_v28  ;;  %1808 = vmatprep.subr.bf16.mxu0 %v2039_v19  ;;  %v2979_v35 = vmov 0.0   ;;  %v2041_v28 = vld [vmem:[%s2956_s3 + $0xb8] sm:$0xff]  }
 0x207   :  { %v829_v59 = vmul.f32 1.442695, %v826_v53  ;;  %v831_v23 = vmul.f32 1.442695, %v827_v15  ;;  %v833_v24 = vmul.f32 1.442695, %v828_v29  ;;  %1852 = vmatprep.subr.bf16.mxu1 %v2979_v35  ;;  %1809 = vmatpush3.bf16.msra.mxu0 %v2040_v6 }
 0x208   :  { %1872 = vmatprep.subr.bf16.mxu0 %v2979_v35 }
 0x209   :  { %2087 = vpow2.f32 %v829_v59  ;;  %v2042_v59 = vld [vmem:[%s2956_s3 + $0xb0] sm:$0xff]  }
 0x20a   :  { %2089 = vpow2.f32 %v831_v23  ;;  %v2045_v23 = vld [vmem:[%s2956_s3 + $0x98] sm:$0xff]  }
 0x20b   :  { %2091 = vpow2.f32 %v833_v24  ;;  %v2046_v24 = vld [vmem:[%s2956_s3 + $0x90] sm:$0xff]  }
 0x212   :  { %v2699_v62 = vpop.eup %2083 }
 0x213   :  { %v2701_v22 = vpop.eup %2085 }
 0x214   :  { %v855_v47 = vadd.f32 %v2701_v22, %v2699_v62 }
 0x216   :  { %v2705_v17 = vpop.eup %2087  ;;  %856 = vadd.xlane.f32.xlu1 %v855_v47  ;;  %v2048_v47 = vld [vmem:[%s2956_s3 + $0x80] sm:$0xff]  }
 0x217   :  { %v2707_v44 = vpop.eup %2089 }
 0x218   :  { %v835_v46 = vadd.f32 %v2707_v44, %v2705_v17  ;;  %v2711_v3 = vpop.eup %2091 }
 0x21a   :  { %v836_v4 = vadd.f32 %v2711_v3, %v835_v46  ;;  %v2049_v46 = vld [vmem:[%s2957_s5 + $0x38] sm:$0xff]  }
 0x21c   :  { %837 = vadd.xlane.f32.xlu1 %v836_v4  ;;  %v2052_v4 = vld [vmem:[%s2957_s5 + $0x20] sm:$0xff]  }
 0x29f   :  { %v857_v0 = vpop.xlane.xlu1 %856 }
 0x2a0   :  { %2093 = vrcp.f32 %v857_v0  ;;  %v1324_v0 = vrot.slane %v869_v45, %v1323_v56 }
 0x2a5   :  { %v838_v27 = vpop.xlane.xlu1 %837 }
 0x2a6   :  { %2095 = vrcp.f32 %v838_v27 }
 0x2ad   :  { %v2094_v58 = vpop.eup %2093 }
 0x2ae   :  { %v859_v30 = vmul.f32 %v2094_v58, %v2699_v62  ;;  %v860_v34 = vmul.f32 %v2094_v58, %v2701_v22  ;;  %v2047_v62 = vld [vmem:[%s2956_s3 + $0x88] sm:$0xff]  }
 0x2b0   :  { %v863_v40 = vcombine.low %v859_v30, %v860_v34  ;;  %v864_v1 = vcombine.high %v859_v30, %v860_v34 }
 0x2b2   :  { %v867_v48 = vmul.f32 %v2097_v55, %v863_v40  ;;  %v868_v33 = vmul.f32 %v2098_v41, %v864_v1  ;;  %v2065_v41 = vld [vmem:[%s2960_s7 + $0x38] sm:$0xff]  }
 0x2b3   :  { %v2096_v10 = vpop.eup %2095 }
 0x2b4   :  { %v924_v42 = vcombine.high %v867_v48, %v868_v33  ;;  %v923_v11 = vcombine.low %v867_v48, %v868_v33  ;;  %v841_v50 = vmul.f32 %v2096_v10, %v2707_v44  ;;  %v840_v54 = vmul.f32 %v2096_v10, %v2705_v17  ;;  %v2066_v33 = vld [vmem:[%s2960_s7 + $0x30] sm:$0xff]  }
 0x2b5   :  { %v842_v22 = vmul.f32 %v2096_v10, %v2711_v3  ;;  %v2050_v3 = vld [vmem:[%s2957_s5 + $0x30] sm:$0xff]   ;;  %v2067_v10 = vld [vmem:[%s2960_s7 + $0x28] sm:$0xff]  }
 0x2b6   :  { %v928_v60 = vpack.c.bf16 %v924_v42, %v924_v42  ;;  %v927_v38 = vpack.c.bf16 %v923_v11, %v923_v11  ;;  %v844_v2 = vmul.f32 %v841_v50, %v2556_v25  ;;  %v843_v53 = vmul.f32 %v840_v54, %v2620_v16  ;;  %v2043_v25 = vld [vmem:[%s2956_s3 + $0xa8] sm:$0xff]   ;;  %v2044_v16 = vld [vmem:[%s2956_s3 + $0xa0] sm:$0xff]   ;;  %v2069_v11 = vld [vmem:[%s2960_s7 + $0x18] sm:$0xff]  }
 0x2b7   :  { %v845_v17 = vmul.f32 %v842_v22, %v2671_v9  ;;  %v2051_v9 = vld [vmem:[%s2957_s5 + $0x28] sm:$0xff]   ;;  %v2068_v42 = vld [vmem:[%s2960_s7 + $0x20] sm:$0xff]   ;;  %v2070_v50 = vld [vmem:[%s2960_s7 + $0x10] sm:$0xff]   ;;  %v1346_v54 = vsub.s32 1, %v2904_v26 }
 0x2b8   :  { %1089 = vmatprep.mubr.bf16.mxu1 %v928_v60  ;;  %v871_v15 = vpack.c.bf16 %v844_v2, %v844_v2  ;;  %v870_v29 = vpack.c.bf16 %v843_v53, %v843_v53 }
 0x2b9   :  { %1090 = vmatmul.mubr.bf16.vlgmr.msra.gmra.mxu1 %v927_v38  ;;  %v872_v44 = vpack.c.bf16 %v845_v17, %v845_v17  ;;  %v1347_v60 = vrot.slane %v869_v45, %v1346_v54 }
 0x2ba   :  { %1853 = vmatpush3.bf16.msra.mxu1 %v2041_v28  ;;  %1273 = vmatprep.mubr.bf16.mxu0 %v871_v15 }
 0x2bb   :  { %1274 = vmatmul.mubr.bf16.vlgmr.msra.gmra.mxu0 %v870_v29  ;;  %1854 = vmatprep.subr.bf16.mxu1 %v2979_v35 }
 0x2bc   :  { %1868 = vmatprep.mubr.msk.bf16.mxu1 %vm2101_vm9, %v2979_v35  ;;  %1888 = vmatprep.mubr.msk.bf16.mxu0 %vm2101_vm9, %v2979_v35 }
 0x2bd   :  { %1873 = vmatpush3.bf16.msra.mxu0 %v2049_v46 }
 0x2be   :  { %1855 = vmatpush3.bf16.msra.mxu1 %v2042_v59  ;;  %1874 = vmatprep.subr.bf16.mxu0 %v2979_v35  ;;  %v2071_v59 = vld [vmem:[%s2960_s7 + $0x8] sm:$0xff]  }
 0x2bf   :  { %1856 = vmatprep.subr.bf16.mxu1 %v2979_v35 }
 0x2c1   :  { %1875 = vmatpush3.bf16.msra.mxu0 %v2050_v3  ;;  %v1565_v3 = vsub.s32 3, %v2904_v26 }
 0x2c2   :  { %1857 = vmatpush3.bf16.msra.mxu1 %v2043_v25  ;;  %1876 = vmatprep.subr.bf16.mxu0 %v2979_v35  ;;  %v2072_v25 = vld [vmem:[%s2960_s7] sm:$0xff]  }
 0x2c3   :  { %1858 = vmatprep.subr.bf16.mxu1 %v2979_v35 }
 0x2c5   :  { %1877 = vmatpush3.bf16.msra.mxu0 %v2051_v9  ;;  %v1566_v9 = vrot.slane %v869_v45, %v1565_v3 }
 0x2c6   :  { %1859 = vmatpush3.bf16.msra.mxu1 %v2044_v16  ;;  %1878 = vmatprep.subr.bf16.mxu0 %v2979_v35  ;;  %v1455_v16 = vsub.s32 2, %v2904_v26 }
 0x2c7   :  { %1860 = vmatprep.subr.bf16.mxu1 %v2979_v35 }
 0x2c9   :  { %1879 = vmatpush3.bf16.msra.mxu0 %v2052_v4 }
 0x2ca   :  { %1861 = vmatpush3.bf16.msra.mxu1 %v2045_v23  ;;  %1880 = vmatprep.subr.bf16.mxu0 %v2979_v35  ;;  %v1456_v23 = vrot.slane %v869_v45, %v1455_v16 }
 0x2cb   :  { %1862 = vmatprep.subr.bf16.mxu1 %v2979_v35 }
 0x2cd   :  { %1881 = vmatpush3.bf16.msra.mxu0 %v2053_v7 }
 0x2ce   :  { %1863 = vmatpush3.bf16.msra.mxu1 %v2046_v24  ;;  %1882 = vmatprep.subr.bf16.mxu0 %v2979_v35 }
 0x2cf   :  { %1864 = vmatprep.subr.bf16.mxu1 %v2979_v35 }
 0x2d1   :  { %1883 = vmatpush3.bf16.msra.mxu0 %v2054_v8 }
 0x2d2   :  { %1865 = vmatpush3.bf16.msra.mxu1 %v2047_v62  ;;  %1884 = vmatprep.subr.bf16.mxu0 %v2979_v35 }
 0x2d3   :  { %1866 = vmatprep.subr.bf16.mxu1 %v2979_v35 }
 0x2d5   :  { %1885 = vmatpush3.bf16.msra.mxu0 %v2055_v43 }
 0x2d6   :  { %1867 = vmatpush3.bf16.msra.mxu1 %v2048_v47  ;;  %1886 = vmatprep.subr.bf16.mxu0 %v2979_v35 }
 0x2d7   :  { %1892 = vmatprep.subr.bf16.mxu1 %v2979_v35 }
 0x2d9   :  { %1869 = vmatmul.mubr.bf16.vlgmr.msra.gmra.mxu1 %v872_v44  ;;  %1887 = vmatpush3.bf16.msra.mxu0 %v2056_v12 }
 0x2da   :  { %1908 = vmatprep.mubr.msk.bf16.mxu1 %vm2101_vm9, %v2979_v35  ;;  %1912 = vmatprep.subr.bf16.mxu0 %v2979_v35 }
 0x2db   :  { %1893 = vmatpush3.bf16.msra.mxu1 %v2057_v13 }
 0x2dc   :  { %1894 = vmatprep.subr.bf16.mxu1 %v2979_v35 }
 0x2df   :  { %1895 = vmatpush3.bf16.msra.mxu1 %v2058_v20 }
 0x2e0   :  { %1896 = vmatprep.subr.bf16.mxu1 %v2979_v35 }
 0x2e3   :  { %1897 = vmatpush3.bf16.msra.mxu1 %v2059_v21 }
 0x2e4   :  { %1898 = vmatprep.subr.bf16.mxu1 %v2979_v35 }
 0x2e7   :  { %1899 = vmatpush3.bf16.msra.mxu1 %v2060_v36 }
 0x2e8   :  { %1900 = vmatprep.subr.bf16.mxu1 %v2979_v35 }
 0x2eb   :  { %1901 = vmatpush3.bf16.msra.mxu1 %v2061_v14 }
 0x2ec   :  { %1902 = vmatprep.subr.bf16.mxu1 %v2979_v35 }
 0x2ef   :  { %1903 = vmatpush3.bf16.msra.mxu1 %v2062_v51 }
 0x2f0   :  { %1904 = vmatprep.subr.bf16.mxu1 %v2979_v35 }
 0x2f3   :  { %1905 = vmatpush3.bf16.msra.mxu1 %v2063_v57 }
 0x2f4   :  { %1906 = vmatprep.subr.bf16.mxu1 %v2979_v35 }
 0x2f7   :  { %1907 = vmatpush3.bf16.msra.mxu1 %v2064_v5 }
 0x379   :  { %v1788_v37 = vpop.f32.mrf.mxu1 }
 0x37b   :  { %v1789_v52 = vpop.f32.mrf.mxu1  ;;  %v1810_v32 = vpop.f32.mrf.mxu0 }
 0x37c   :  { %v1790_v19 = vadd.f32 %v1789_v52, %v1788_v37 }
 0x37d   :  { %v1791_v31 = vpop.f32.mrf.mxu1  ;;  %v1811_v39 = vpop.f32.mrf.mxu0 }
 0x37e   :  { %v1812_v49 = vadd.f32 %v1811_v39, %v1810_v32 }
 0x37f   :  { %v1792_v61 = vpop.f32.mrf.mxu1  ;;  %v1813_v63 = vpop.f32.mrf.mxu0 }
 0x380   :  { %v1276_v6 = vadd.f32 %v1812_v49, %v1790_v19 }
 0x381   :  { %v1814_v18 = vpop.f32.mrf.mxu0 }
 0x399   :  { %v1315_v27 = vpop.f32.mrf.mxu1 }
 0x39a   :  { %v1316_v58 = vadd.f32 %v1315_v27, %v1276_v6 }
 0x39b   :  { %v1870_v30 = vpop.f32.mrf.mxu1 }
 0x39c   :  { %v1325_v34 = vadd.f32 %v1324_v0, %v1316_v58 }
 0x39d   :  { %v1318_v40 = vpop.f32.mrf.mxu1 }
 0x39e   :  { %v1326_v1 = vmax.f32 %v1325_v34, 0.0 }
 0x39f   :  { %v1871_v55 = vpop.f32.mrf.mxu1 }
 0x3a0   :  { %v1327_v48 = vpack.c.bf16 %v1326_v1, %v1326_v1 }
 0x3a2   :  { %1889 = vmatmul.mubr.bf16.vlgmr.msra.gmra.mxu0 %v1327_v48 }
 0x3a3   :  { %1928 = vmatprep.mubr.msk.bf16.mxu0 %vm2101_vm9, %v2979_v35  ;;  %1913 = vmatpush3.bf16.msra.mxu0 %v2065_v41 }
 0x3a4   :  { %1914 = vmatprep.subr.bf16.mxu0 %v2979_v35 }
 0x3a7   :  { %1915 = vmatpush3.bf16.msra.mxu0 %v2066_v33 }
 0x3a8   :  { %1916 = vmatprep.subr.bf16.mxu0 %v2979_v35 }
 0x3ab   :  { %1917 = vmatpush3.bf16.msra.mxu0 %v2067_v10 }
 0x3ac   :  { %1918 = vmatprep.subr.bf16.mxu0 %v2979_v35 }
 0x3af   :  { %1919 = vmatpush3.bf16.msra.mxu0 %v2068_v42 }
 0x3b0   :  { %1920 = vmatprep.subr.bf16.mxu0 %v2979_v35 }
 0x3b3   :  { %1921 = vmatpush3.bf16.msra.mxu0 %v2069_v11 }
 0x3b4   :  { %1922 = vmatprep.subr.bf16.mxu0 %v2979_v35 }
 0x3b7   :  { %1923 = vmatpush3.bf16.msra.mxu0 %v2070_v50 }
 0x3b8   :  { %1924 = vmatprep.subr.bf16.mxu0 %v2979_v35 }
 0x3bb   :  { %1925 = vmatpush3.bf16.msra.mxu0 %v2071_v59 }
 0x3bc   :  { %1926 = vmatprep.subr.bf16.mxu0 %v2979_v35 }
 0x3bf   :  { %1927 = vmatpush3.bf16.msra.mxu0 %v2072_v25 }
 0x462   :  { %v1430_v38 = vpop.f32.mrf.mxu0 }
 0x463   :  { %v1431_v28 = vadd.f32 %v1430_v38, %v1347_v60 }
 0x464   :  { %v1890_v2 = vpop.f32.mrf.mxu0 }
 0x465   :  { %v1436_v53 = vpack.c.bf16 %v1431_v28, %v1431_v28 }
 0x466   :  { %v1433_v15 = vpop.f32.mrf.mxu0 }
 0x467   :  { %1909 = vmatmul.mubr.bf16.vlgmr.msra.gmra.mxu1 %v1436_v53 }
 0x468   :  { %v1891_v29 = vpop.f32.mrf.mxu0 }
 0x527   :  { %v1539_v24 = vpop.f32.mrf.mxu1 }
 0x528   :  { %v1540_v62 = vadd.f32 %v1539_v24, %v1456_v23 }
 0x529   :  { %v1910_v22 = vpop.f32.mrf.mxu1 }
 0x52a   :  { %v1545_v47 = vmax.f32 %v1540_v62, 0.0 }
 0x52b   :  { %v1542_v17 = vpop.f32.mrf.mxu1 }
 0x52c   :  { %v1546_v44 = vpack.c.bf16 %v1545_v47, %v1545_v47 }
 0x52d   :  { %v1911_v46 = vpop.f32.mrf.mxu1 }
 0x52e   :  { %1929 = vmatmul.mubr.bf16.vlgmr.msra.gmra.mxu0 %v1546_v44 }
 0x5ee   :  { %v1649_v35 = vpop.f32.mrf.mxu0 }
 0x5ef   :  { %v1650_v4 = vadd.f32 %v1649_v35, %v1566_v9 }
 0x5f0   :  { %v1930_v7 = vpop.f32.mrf.mxu0 }
 0x5f1   :  { %1655 = vst [vmem:[%s2961_s9] sm:$0xff] %v1650_v4 }
 0x5f2   :  { %v1652_v8 = vpop.f32.mrf.mxu0 }
 0x5f4   :  { %v1931_v43 = vpop.f32.mrf.mxu0 }

</bundles_post_ra>
